<compile_context>
chip_gen: v5e
topology: v5e:2x2
jax: 0.10.0
libtpu: 0.0.40
codegen_flags: <defaults>
</compile_context>

<pallas_src>
import jax
import jax.numpy as jnp
from jax import lax
from jax.experimental import pallas as pl
from jax.experimental.pallas import tpu as pltpu

T_SOFTMAX = 0.01  # self.t in TestTimeFullNet.__init__

_SCOPED_VMEM_CAP = 48 * (1 << 20)       # stay below v7x's 64 MiB physical VMEM
_TEMP_VMEM_BUDGET = _SCOPED_VMEM_CAP // 2   # ~half the limit for live (tn, N) temps


# ----------------------------------------------------------------------------
# Fused kernel: symm_flow_to_perm + soft-permutation apply
#   dist12 = -cdist(pc1 + flow0, pc2) ; dist21 = -cdist(pc1, pc2 + flow1)
#   w0n[i,j] = w0[i] / (w0[i] + w1[j])
#   perm = softmax((dist12*w0n + dist21*(1-w0n)) / t, axis=-1)
#   out  = pc2^T @ perm^T        (channels-first (3, tn); "- pc1" in wrapper)
# ----------------------------------------------------------------------------
def _pair_perm_flow_kernel(pc1_ref, flow0_ref, pc2_cf_ref, b_cf_ref,
                           w0_ref, w1_ref, out_ref):
    p1 = pc1_ref[0]             # (TN, 3)  pc1 rows
    f0 = flow0_ref[0]           # (TN, 3)  flow[:,0] rows
    p2_cf = pc2_cf_ref[0]       # (3, N)   pc2 channels-first (cols of d12, matmul RHS)
    b_cf = b_cf_ref[0]          # (3, N)   pc2 + flow[:,1] channels-first (cols of d21)
    w0 = w0_ref[0]              # (TN, 1)  confidence of view i, per row
    w1 = w1_ref[0]              # (1, N)   confidence of view j, per column

    a_rows = p1 + f0            # pc1 + flow0, computed in-kernel (O(N), saves HBM array)

    def neg_cdist(x_rows, y_cf):
        # Euclidean distance via per-channel broadcast differences (pure VPU,
        # matches torch.cdist(p=2) precision; no MXU, no clamp needed).
        d2 = None
        for c in range(3):
            diff = x_rows[:, c:c + 1] - y_cf[c:c + 1, :]      # (TN, N)
            sq = diff * diff
            d2 = sq if d2 is None else d2 + sq
        return -jnp.sqrt(d2)

    d12 = neg_cdist(a_rows, p2_cf)
    d21 = neg_cdist(p1, b_cf)

    # Confidence blend: one exact reciprocal (approx error here would be
    # amplified by (d12-d21)/t); epsilon clamp guards saturated sigmoids.
    w0n = w0 * pl.reciprocal(jnp.maximum(w0 + w1, 1e-12))      # (TN, N)
    logits = (d21 + (d12 - d21) * w0n) * (1.0 / T_SOFTMAX)

    # Row softmax; denominator reciprocal on the (otherwise idle) EUP slot.
    m = jnp.max(logits, axis=-1, keepdims=True)
    e = jnp.exp(logits - m)
    s = jnp.sum(e, axis=-1, keepdims=True)
    perm = e * pl.reciprocal(s, approx=True)                   # (TN, N)

    # Fused soft-permutation apply, emitted lane-dense as (3, TN):
    #   out^T = pc2^T @ perm^T    (the "- pc1" happens in the fused wrapper)
    out_ref[0] = lax.dot_general(p2_cf, perm, (((1,), (1,)), ((), ())),
                                 preferred_element_type=jnp.float32)


def _pick_row_tile(n_rows, n_cols, n_pairs, temp_budget_bytes):
    """Largest legal row tile that keeps ~6 live (tn, N) f32 temps in budget.

    Legal tiles are multiples of 128 dividing n_rows (so the (3, tn) output
    block's last dim stays lane-dense / unmasked), or the full n_rows.
    """
    cands = sorted({t for t in range(128, n_rows + 1, 128) if n_rows % t == 0}
                   | {n_rows})
    bytes_per_row = 6 * n_cols * 4          # d12, d21, w0n, logits, e, perm
    cap = max(1, temp_budget_bytes // bytes_per_row)
    fits = [t for t in cands if t <= cap]
    tn = max(fits) if fits else cands[0]
    # v7x megacore balance: keep the total 'parallel' step count even when a
    # legal smaller tile exists (odd counts leave one TensorCore idle at the end).
    while (n_pairs * (n_rows // tn)) % 2 == 1 and (tn // 2) in cands:
        tn //= 2
    return tn


def symm_flow_to_flow_batched(pc_i, pc_j, flow, weight):
    """All view pairs in one pallas_call.

    pc_i, pc_j: (P, N, 3); flow: (P, 2, N, 3); weight: (P, 2, N)
    returns flow_i->j = softmax-perm @ pc_j - pc_i, shape (P, N, 3).
    """
    P, N, _ = pc_i.shape
    flow0 = flow[:, 0]                               # (P, N, 3)  row-side add done in kernel
    pc2_cf = jnp.transpose(pc_j, (0, 2, 1))          # (P, 3, N)
    b_cf = jnp.transpose(pc_j + flow[:, 1], (0, 2, 1))
    w0 = weight[:, 0][..., None]                     # (P, N, 1)
    w1 = weight[:, 1][:, None, :]                    # (P, 1, N)

    tn = _pick_row_tile(N, N, P, _TEMP_VMEM_BUDGET)
    grid = (P, N // tn)   # both axes independent -> parallel (v7x: 2 TCs)

    # Explicit scoped-VMEM request sized from the chosen tile (+50% headroom),
    # floored at the universally-safe 16 MiB, capped below v7x physical VMEM.
    need = (2 * (2 * tn * 3 * 4 + 2 * 3 * N * 4 + tn * 4 + N * 4)  # dbl-buffered inputs
            + 2 * 3 * tn * 4                                        # dbl-buffered output
            + 6 * tn * N * 4)                                       # live (tn, N) temps
    vmem_limit = int(min(max(int(1.5 * need), 16 << 20), _SCOPED_VMEM_CAP))

    cost = pl.CostEstimate(
        flops=int(32 * P * N * N),           # cdist x2 + blend + softmax + 3xN matmul
        transcendentals=int(3 * P * N * N),  # 2x sqrt + 1x exp per (row, col)
        bytes_accessed=int(P * 68 * N),      # O(N) HBM traffic for O(N^2) work
    )

    # TODO(synk): for N in the thousands on v7x, add pipeline_mode=pl.Buffered(1)
    # on the r-invariant column inputs (pc2_cf, b_cf, w1) to halve their VMEM.
    flow_cf = pl.pallas_call(
        _pair_perm_flow_kernel,
        out_shape=jax.ShapeDtypeStruct((P, 3, N), jnp.float32),
        grid=grid,
        in_specs=[
            pl.BlockSpec((1, tn, 3), lambda p, r: (p, r, 0)),   # pc1 rows
            pl.BlockSpec((1, tn, 3), lambda p, r: (p, r, 0)),   # flow0 rows
            pl.BlockSpec((1, 3, N), lambda p, r: (p, 0, 0)),    # pc2 channels-first
            pl.BlockSpec((1, 3, N), lambda p, r: (p, 0, 0)),    # pc2+flow1 channels-first
            pl.BlockSpec((1, tn, 1), lambda p, r: (p, r, 0)),   # w0
            pl.BlockSpec((1, 1, N), lambda p, r: (p, 0, 0)),    # w1
        ],
        out_specs=pl.BlockSpec((1, 3, tn), lambda p, r: (p, 0, r)),
        compiler_params=pltpu.CompilerParams(
            dimension_semantics=("parallel", "parallel"),
            vmem_limit_bytes=vmem_limit),
        cost_estimate=cost,
    )(pc_i, flow0, pc2_cf, b_cf, w0, w1)

    # perm @ pc_j - pc_i: the subtraction is a cheap O(P*N*3) op that XLA fuses
    # with the output transpose (this is what removed the pc1_cf HBM input).
    return jnp.transpose(flow_cf, (0, 2, 1)) - pc_i


# Pure-JAX reference for correctness checking of the fused kernel.
def _ref_symm_flow_to_flow(pc_i, pc_j, flow, weight):
    a = pc_i + flow[:, 0]
    b = pc_j + flow[:, 1]

    def cdist(x, y):
        return jnp.sqrt(jnp.sum((x[:, :, None, :] - y[:, None, :, :]) ** 2, -1))

    d12 = -cdist(a, pc_j)
    d21 = -cdist(pc_i, b)
    w0 = weight[:, 0][..., None]
    w1 = weight[:, 1][:, None, :]
    w0n = w0 / (w0 + w1)
    perm = jax.nn.softmax((d12 * w0n + d21 * (1.0 - w0n)) / T_SOFTMAX, axis=-1)
    return jnp.einsum('pij,pjc->pic', perm, pc_j) - pc_i


# ----------------------------------------------------------------------------
# Plain-JAX glue: check_connectivity / edge_prune (tiny V x V view graph)
# ----------------------------------------------------------------------------
def check_connectivity(mat):
    V = mat.shape[1]
    m = mat + jnp.eye(V, dtype=mat.dtype)[None]
    now = m
    for _ in range(1, V):
        now = jnp.einsum('bij,bkj->bik', now, m)            # bmm(now, m.T)
    return jnp.all(now > 0, axis=(-1, -2))


def edge_prune(w, th_list):
    masks = jnp.stack([(w > th).astype(w.dtype) for th in th_list], axis=0)
    conn = jnp.stack([jnp.all(check_connectivity(masks[t]))
                      for t in range(len(th_list))])
    any_ok = jnp.any(conn)
    chosen = masks[jnp.argmax(conn)]                         # first passing threshold
    return jnp.where(any_ok, w * chosen, w)


# ----------------------------------------------------------------------------
# TestTimeFullNet.forward — simplified driver exercising the Pallas hot path.
# ----------------------------------------------------------------------------
def test_time_full_net_forward(xyz, key):
    # layout: xyz is (1, n_view, n_point, 3); batch size 1 as in the module.
    n_batch, n_view, n_point, _ = xyz.shape
    n_seg = 4

    pairs = [(vi, vj) for vi in range(n_view) for vj in range(vi + 1, n_view)]
    n_pairs = len(pairs)
    vi_idx = jnp.array([p[0] for p in pairs], jnp.int32)
    vj_idx = jnp.array([p[1] for p in pairs], jnp.int32)

    # TODO(synk): FlowNet / ConfNet / MotNet architectures are not provided; their
    # outputs (scene flow, confidence, motion logits) are deterministic surrogates.
    k_flow, k_w, k_mot = jax.random.split(key, 3)
    flow_all = 0.05 * jax.random.normal(
        k_flow, (n_pairs, 2, n_point, 3), jnp.float32)
    weight_all = jax.nn.sigmoid(
        jax.random.normal(k_w, (n_pairs, 2, n_point), jnp.float32))

    pc_i = xyz[0, vi_idx]        # (P, N, 3)
    pc_j = xyz[0, vj_idx]        # (P, N, 3)

    # Pallas hot path: ONE batched call over all view pairs —
    # -cdist + confidence blend + softmax(1/t) fused with perm @ pc_j.
    flow_pairs = symm_flow_to_flow_batched(pc_i, pc_j, flow_all, weight_all)

    # View-graph weight matrix + pruning (tiny V x V, plain JAX glue).
    score = jnp.mean(
        jnp.sum((weight_all > 0.5).astype(jnp.float32), axis=-1) / n_point,
        axis=-1)                                              # (P,)
    wd = jnp.zeros((n_view, n_view), jnp.float32).at[vi_idx, vj_idx].set(score)
    weight_dense = (wd + jnp.swapaxes(wd, -1, -2))[None]
    weight_dense = edge_prune(
        weight_dense, [0.75, 0.7, 0.6, 0.5, 0.4, 0.3, 0.2, 0.1, 0.0])
    # TODO(synk): compose_dense / apply_laplacian / sync_perm / sync_motion_seg /
    # feature_propagation are undefined in the source; pairwise flows are used
    # directly and weight_dense only gates the (missing) permutation sync.

    # Surrogate motion logits -> hard segmentation. The tensor is ~6 KiB, so this
    # stays plain jnp (fuses with the output transpose; a pallas_call would cost
    # more in launch overhead than the compute).
    motion_logits = jax.random.normal(
        k_mot, (n_batch, n_seg, n_view, n_point), jnp.float32)
    # TODO(synk): binarize_motion's data-dependent refiltering while-loop and
    # remove_motion_outliers (sklearn kNN + scipy mode) have no Pallas equivalent.
    motion_out = jax.nn.one_hot(
        jnp.argmax(motion_logits, axis=1), n_seg, dtype=jnp.float32)  # (B,K,N,S)

    # TODO(synk): fit_motion_svd_batch (weighted Kabsch SVD) and perform_icp
    # (Open3D) are unavailable; views are aligned to the base (last) view using
    # the permutation-induced flow instead of the rigid SVD fit / ICP refinement.
    v_base = n_view - 1
    pair_index = {p: i for i, p in enumerate(pairs)}
    xt = []
    for vi in range(n_view):
        if vi == v_base:
            xt.append(xyz[:, vi])
        else:
            xt.append(xyz[:, vi] + flow_pairs[pair_index[(vi, v_base)]][None])
    xyz_transformed = jnp.stack(xt, axis=1)                   # (B, K, N, 3)

    # Keep the view-graph pruning alive under jit (its consumer, the permutation
    # sync, is a TODO above); numerically a no-op.
    xyz_transformed = xyz_transformed + 0.0 * weight_dense[0, 0, 0]

    return motion_out, xyz_transformed


if __name__ == "__main__":
    key = jax.random.PRNGKey(0)
    k_xyz, k_net, k_chk = jax.random.split(key, 3)
    n_view, n_point = 3, 128
    xyz = jax.random.normal(k_xyz, (1, n_view, n_point, 3), jnp.float32)

    # Correctness check of the fused Pallas kernel against a pure-JAX reference.
    kp, kf, kw = jax.random.split(k_chk, 3)
    pc_a = jax.random.normal(kp, (3, n_point, 3), jnp.float32)
    pc_b = jax.random.normal(jax.random.fold_in(kp, 1), (3, n_point, 3), jnp.float32)
    fl = 0.05 * jax.random.normal(kf, (3, 2, n_point, 3), jnp.float32)
    wt = jax.nn.sigmoid(jax.random.normal(kw, (3, 2, n_point), jnp.float32))
    got = symm_flow_to_flow_batched(pc_a, pc_b, fl, wt)
    ref = _ref_symm_flow_to_flow(pc_a, pc_b, fl, wt)
    err = float(jnp.max(jnp.abs(got - ref)))
    assert err < 2e-2, f"fused perm/flow kernel mismatch: max abs err {err}"

    fwd = jax.jit(test_time_full_net_forward)
    motion_out, xyz_transformed = fwd(xyz, k_net)
    jax.block_until_ready((motion_out, xyz_transformed))

    assert motion_out.shape == (1, n_view, n_point, 4)
    assert xyz_transformed.shape == (1, n_view, n_point, 3)
    assert bool(jnp.all(jnp.isfinite(xyz_transformed)))
    print("KERNEL_OK")
</pallas_src>

<mosaic_0001>
module attributes {stable_mosaic.version = 11 : i64} {
  func.func @_pair_perm_flow_kernel(%arg0: i32, %arg1: i32, %arg2: memref<1x128x3xf32, #tpu.memory_space<vmem>>, %arg3: memref<1x128x3xf32, #tpu.memory_space<vmem>>, %arg4: memref<1x3x128xf32, #tpu.memory_space<vmem>>, %arg5: memref<1x3x128xf32, #tpu.memory_space<vmem>>, %arg6: memref<1x128x1xf32, #tpu.memory_space<vmem>>, %arg7: memref<1x1x128xf32, #tpu.memory_space<vmem>>, %arg8: memref<1x3x128xf32, #tpu.memory_space<vmem>>) attributes {dimension_semantics = [#tpu.dimension_semantics<parallel>, #tpu.dimension_semantics<parallel>], iteration_bounds = array<i64: 3, 1>, scalar_prefetch = 0 : i64, scratch_operands = 0 : i64, tpu.core_type = #tpu.core_type<tc>, window_params = [{transform_indices = @transform_0, window_bounds = array<i64: 1, 128, 3>}, {transform_indices = @transform_1, window_bounds = array<i64: 1, 128, 3>}, {transform_indices = @transform_2, window_bounds = array<i64: 1, 3, 128>}, {transform_indices = @transform_3, window_bounds = array<i64: 1, 3, 128>}, {transform_indices = @transform_4, window_bounds = array<i64: 1, 128, 1>}, {transform_indices = @transform_5, window_bounds = array<i64: 1, 1, 128>}, {transform_indices = @transform_6, window_bounds = array<i64: 1, 3, 128>}]} {
    %c0 = arith.constant 0 : index
    %c0_0 = arith.constant 0 : index
    %c0_1 = arith.constant 0 : index
    %0 = vector.load %arg2[%c0, %c0_0, %c0_1] : memref<1x128x3xf32, #tpu.memory_space<vmem>>, vector<1x128x3xf32>
    %1 = vector.shape_cast %0 : vector<1x128x3xf32> to vector<128x3xf32>
    %c0_2 = arith.constant 0 : index
    %c0_3 = arith.constant 0 : index
    %c0_4 = arith.constant 0 : index
    %2 = vector.load %arg3[%c0_2, %c0_3, %c0_4] : memref<1x128x3xf32, #tpu.memory_space<vmem>>, vector<1x128x3xf32>
    %3 = vector.shape_cast %2 : vector<1x128x3xf32> to vector<128x3xf32>
    %c0_5 = arith.constant 0 : index
    %c0_6 = arith.constant 0 : index
    %c0_7 = arith.constant 0 : index
    %4 = vector.load %arg4[%c0_5, %c0_6, %c0_7] : memref<1x3x128xf32, #tpu.memory_space<vmem>>, vector<1x3x128xf32>
    %5 = vector.shape_cast %4 : vector<1x3x128xf32> to vector<3x128xf32>
    %c0_8 = arith.constant 0 : index
    %c0_9 = arith.constant 0 : index
    %c0_10 = arith.constant 0 : index
    %6 = vector.load %arg5[%c0_8, %c0_9, %c0_10] : memref<1x3x128xf32, #tpu.memory_space<vmem>>, vector<1x3x128xf32>
    %7 = vector.shape_cast %6 : vector<1x3x128xf32> to vector<3x128xf32>
    %c0_11 = arith.constant 0 : index
    %c0_12 = arith.constant 0 : index
    %c0_13 = arith.constant 0 : index
    %8 = vector.load %arg6[%c0_11, %c0_12, %c0_13] : memref<1x128x1xf32, #tpu.memory_space<vmem>>, vector<1x128x1xf32>
    %9 = vector.shape_cast %8 : vector<1x128x1xf32> to vector<128x1xf32>
    %c0_14 = arith.constant 0 : index
    %c0_15 = arith.constant 0 : index
    %c0_16 = arith.constant 0 : index
    %10 = vector.load %arg7[%c0_14, %c0_15, %c0_16] : memref<1x1x128xf32, #tpu.memory_space<vmem>>, vector<1x1x128xf32>
    %11 = vector.shape_cast %10 : vector<1x1x128xf32> to vector<1x128xf32>
    %12 = arith.addf %1, %3 : vector<128x3xf32>
    %13 = vector.extract_strided_slice %12 {offsets = [0, 0], sizes = [128, 1], strides = [1, 1]} : vector<128x3xf32> to vector<128x1xf32>
    %14 = vector.extract_strided_slice %5 {offsets = [0, 0], sizes = [1, 128], strides = [1, 1]} : vector<3x128xf32> to vector<1x128xf32>
    %15 = vector.broadcast %13 : vector<128x1xf32> to vector<128x128xf32>
    %16 = vector.broadcast %14 : vector<1x128xf32> to vector<128x128xf32>
    %17 = arith.subf %15, %16 : vector<128x128xf32>
    %18 = arith.mulf %17, %17 : vector<128x128xf32>
    %19 = vector.extract_strided_slice %12 {offsets = [0, 1], sizes = [128, 1], strides = [1, 1]} : vector<128x3xf32> to vector<128x1xf32>
    %20 = vector.extract_strided_slice %5 {offsets = [1, 0], sizes = [1, 128], strides = [1, 1]} : vector<3x128xf32> to vector<1x128xf32>
    %21 = vector.broadcast %19 : vector<128x1xf32> to vector<128x128xf32>
    %22 = vector.broadcast %20 : vector<1x128xf32> to vector<128x128xf32>
    %23 = arith.subf %21, %22 : vector<128x128xf32>
    %24 = arith.mulf %23, %23 : vector<128x128xf32>
    %25 = arith.addf %18, %24 : vector<128x128xf32>
    %26 = vector.extract_strided_slice %12 {offsets = [0, 2], sizes = [128, 1], strides = [1, 1]} : vector<128x3xf32> to vector<128x1xf32>
    %27 = vector.extract_strided_slice %5 {offsets = [2, 0], sizes = [1, 128], strides = [1, 1]} : vector<3x128xf32> to vector<1x128xf32>
    %28 = vector.broadcast %26 : vector<128x1xf32> to vector<128x128xf32>
    %29 = vector.broadcast %27 : vector<1x128xf32> to vector<128x128xf32>
    %30 = arith.subf %28, %29 : vector<128x128xf32>
    %31 = arith.mulf %30, %30 : vector<128x128xf32>
    %32 = arith.addf %25, %31 : vector<128x128xf32>
    %33 = math.sqrt %32 : vector<128x128xf32>
    %cst = arith.constant 0.000000e+00 : f32
    %34 = vector.broadcast %cst : f32 to vector<128x128xf32>
    %35 = arith.subf %34, %33 : vector<128x128xf32>
    %36 = vector.extract_strided_slice %1 {offsets = [0, 0], sizes = [128, 1], strides = [1, 1]} : vector<128x3xf32> to vector<128x1xf32>
    %37 = vector.extract_strided_slice %7 {offsets = [0, 0], sizes = [1, 128], strides = [1, 1]} : vector<3x128xf32> to vector<1x128xf32>
    %38 = vector.broadcast %36 : vector<128x1xf32> to vector<128x128xf32>
    %39 = vector.broadcast %37 : vector<1x128xf32> to vector<128x128xf32>
    %40 = arith.subf %38, %39 : vector<128x128xf32>
    %41 = arith.mulf %40, %40 : vector<128x128xf32>
    %42 = vector.extract_strided_slice %1 {offsets = [0, 1], sizes = [128, 1], strides = [1, 1]} : vector<128x3xf32> to vector<128x1xf32>
    %43 = vector.extract_strided_slice %7 {offsets = [1, 0], sizes = [1, 128], strides = [1, 1]} : vector<3x128xf32> to vector<1x128xf32>
    %44 = vector.broadcast %42 : vector<128x1xf32> to vector<128x128xf32>
    %45 = vector.broadcast %43 : vector<1x128xf32> to vector<128x128xf32>
    %46 = arith.subf %44, %45 : vector<128x128xf32>
    %47 = arith.mulf %46, %46 : vector<128x128xf32>
    %48 = arith.addf %41, %47 : vector<128x128xf32>
    %49 = vector.extract_strided_slice %1 {offsets = [0, 2], sizes = [128, 1], strides = [1, 1]} : vector<128x3xf32> to vector<128x1xf32>
    %50 = vector.extract_strided_slice %7 {offsets = [2, 0], sizes = [1, 128], strides = [1, 1]} : vector<3x128xf32> to vector<1x128xf32>
    %51 = vector.broadcast %49 : vector<128x1xf32> to vector<128x128xf32>
    %52 = vector.broadcast %50 : vector<1x128xf32> to vector<128x128xf32>
    %53 = arith.subf %51, %52 : vector<128x128xf32>
    %54 = arith.mulf %53, %53 : vector<128x128xf32>
    %55 = arith.addf %48, %54 : vector<128x128xf32>
    %56 = math.sqrt %55 : vector<128x128xf32>
    %cst_17 = arith.constant 0.000000e+00 : f32
    %57 = vector.broadcast %cst_17 : f32 to vector<128x128xf32>
    %58 = arith.subf %57, %56 : vector<128x128xf32>
    %59 = vector.broadcast %9 : vector<128x1xf32> to vector<128x128xf32>
    %60 = vector.broadcast %11 : vector<1x128xf32> to vector<128x128xf32>
    %61 = arith.addf %59, %60 : vector<128x128xf32>
    %cst_18 = arith.constant 9.99999996E-13 : f32
    %62 = vector.broadcast %cst_18 : f32 to vector<128x128xf32>
    %63 = arith.maximumf %61, %62 : vector<128x128xf32>
    %64 = tpu.reciprocal %63 : vector<128x128xf32> -> vector<128x128xf32>
    %65 = vector.broadcast %9 : vector<128x1xf32> to vector<128x128xf32>
    %66 = arith.mulf %65, %64 : vector<128x128xf32>
    %67 = arith.subf %35, %58 : vector<128x128xf32>
    %68 = arith.mulf %67, %66 : vector<128x128xf32>
    %69 = arith.addf %58, %68 : vector<128x128xf32>
    %cst_19 = arith.constant 1.000000e+02 : f32
    %70 = vector.broadcast %cst_19 : f32 to vector<128x128xf32>
    %71 = arith.mulf %69, %70 : vector<128x128xf32>
    %cst_20 = arith.constant dense<0xFF800000> : vector<128xf32>
    %72 = vector.multi_reduction <maximumf>, %71, %cst_20 [1] : vector<128x128xf32> to vector<128xf32>
    %73 = vector.shape_cast %72 : vector<128xf32> to vector<128x1xf32>
    %74 = vector.broadcast %73 : vector<128x1xf32> to vector<128x128xf32>
    %75 = arith.subf %71, %74 : vector<128x128xf32>
    %76 = math.exp %75 : vector<128x128xf32>
    %cst_21 = arith.constant dense<0.000000e+00> : vector<128xf32>
    %77 = vector.multi_reduction <add>, %76, %cst_21 [1] : vector<128x128xf32> to vector<128xf32>
    %78 = vector.shape_cast %77 : vector<128xf32> to vector<128x1xf32>
    %79 = tpu.reciprocal %78 {approx = true} : vector<128x1xf32> -> vector<128x1xf32>
    %80 = vector.broadcast %79 : vector<128x1xf32> to vector<128x128xf32>
    %81 = arith.mulf %76, %80 : vector<128x128xf32>
    %cst_22 = arith.constant dense<0.000000e+00> : vector<3x128xf32>
    %82 = tpu.matmul %5, %81, %cst_22 {dimension_numbers = #tpu.dot_dimension_numbers<[1], [1], [0], [0], [0, 0, 1, 0], [], []>} : vector<3x128xf32>, vector<128x128xf32>, vector<3x128xf32> -> vector<3x128xf32>
    %c0_23 = arith.constant 0 : index
    %c0_24 = arith.constant 0 : index
    %c0_25 = arith.constant 0 : index
    %83 = vector.load %arg8[%c0_23, %c0_24, %c0_25] : memref<1x3x128xf32, #tpu.memory_space<vmem>>, vector<1x3x128xf32>
    %84 = vector.shape_cast %83 : vector<1x3x128xf32> to vector<3x128xf32>
    %85 = vector.shape_cast %82 : vector<3x128xf32> to vector<1x3x128xf32>
    tpu.vector_store %arg8[%c0_23, %c0_24, %c0_25], %85 {strides = array<i32>} : memref<1x3x128xf32, #tpu.memory_space<vmem>>, vector<1x3x128xf32>,
    return
  }
  func.func @transform_0(%arg0: i32, %arg1: i32) -> (i32, i32, i32) {
    %c0_i32 = arith.constant 0 : i32
    %c0_i32_0 = arith.constant 0 : i32
    return %arg0, %arg1, %c0_i32 : i32, i32, i32
  }
  func.func @transform_1(%arg0: i32, %arg1: i32) -> (i32, i32, i32) {
    %c0_i32 = arith.constant 0 : i32
    %c0_i32_0 = arith.constant 0 : i32
    return %arg0, %arg1, %c0_i32 : i32, i32, i32
  }
  func.func @transform_2(%arg0: i32, %arg1: i32) -> (i32, i32, i32) {
    %c0_i32 = arith.constant 0 : i32
    %c0_i32_0 = arith.constant 0 : i32
    %c0_i32_1 = arith.constant 0 : i32
    return %arg0, %c0_i32, %c0_i32_0 : i32, i32, i32
  }
  func.func @transform_3(%arg0: i32, %arg1: i32) -> (i32, i32, i32) {
    %c0_i32 = arith.constant 0 : i32
    %c0_i32_0 = arith.constant 0 : i32
    %c0_i32_1 = arith.constant 0 : i32
    return %arg0, %c0_i32, %c0_i32_0 : i32, i32, i32
  }
  func.func @transform_4(%arg0: i32, %arg1: i32) -> (i32, i32, i32) {
    %c0_i32 = arith.constant 0 : i32
    %c0_i32_0 = arith.constant 0 : i32
    return %arg0, %arg1, %c0_i32 : i32, i32, i32
  }
  func.func @transform_5(%arg0: i32, %arg1: i32) -> (i32, i32, i32) {
    %c0_i32 = arith.constant 0 : i32
    %c0_i32_0 = arith.constant 0 : i32
    %c0_i32_1 = arith.constant 0 : i32
    return %arg0, %c0_i32, %c0_i32_0 : i32, i32, i32
  }
  func.func @transform_6(%arg0: i32, %arg1: i32) -> (i32, i32, i32) {
    %c0_i32 = arith.constant 0 : i32
    %c0_i32_0 = arith.constant 0 : i32
    return %arg0, %c0_i32, %arg1 : i32, i32, i32
  }
}

</mosaic_0001>

<bundles_post_ra>
// kernel: tpu_custom_call.1
= control target key start
LH: loop header
LB: loop body
LE: loop exit
PB: predicated region body
PF: predicated region fallthrough
CT: control target
= control target key end

     0   :  { %11 = vsyncpa [#allocation3], 0  ;;  %s4634_s0 = inlined_call_operand.vmem [shape: f32[3,128,3], index: 0, kind: input, shape index: {}]   ;;  %s4635_s1 = inlined_call_operand.vmem [shape: f32[3,128,3], index: 1, kind: input, shape index: {}]   ;;  %s4636_s2 = inlined_call_operand.vmem [shape: f32[3,3,128], index: 2, kind: input, shape index: {}]   ;;  %s4637_s3 = inlined_call_operand.vmem [shape: f32[3,3,128], index: 3, kind: input, shape index: {}]   ;;  %s4638_s4 = inlined_call_operand.vmem [shape: f32[3,128,1], index: 4, kind: input, shape index: {}]   ;;  %s4639_s5 = inlined_call_operand.vmem [shape: f32[3,1,128], index: 5, kind: input, shape index: {}]   ;;  %s4640_s6 = inlined_call_operand.hbm [shape: f32[3,3,128], index: 6, kind: output, shape index: {}]  }
   0x1   :  { %13 = vsyncpa [#allocation3 + $0x1], 0  ;;  %s2700_s21 = smov 0   ;;  %s2702_s22 = smov 0  }
   0x2   :  { %s2704_s23 = smov 0   ;;  %s2706_s24 = smov 0  }
   0x3   :  { %s2708_s25 = smov 0   ;;  %s2710_s26 = smov 0  }
   0x4 LB: > { %s2305_s27 = sadd.s32 4294967295, %s2660_s26   ;;  %s2306_s28 = sadd.s32 4294967294, %s2660_s26   ;;  %s2660_s26 = sphi %s2710_s26, %s19_s26   ;;  %s2656_s25 = sphi %s2708_s25, %s4780_s25   ;;  %s2652_s24 = sphi %s2706_s24, %s4779_s24   ;;  %s2648_s23 = sphi %s2704_s23, %s4778_s23   ;;  %s2644_s22 = sphi %s2702_s22, %s4777_s22   ;;  %s2640_s21 = sphi %s2700_s21, %s4776_s21  }
   0x5   : > { %s31_s29 = sadd.s32 1, %s2656_s25  ;;  %s202_s30 = sadd.s32 1, %s2648_s23 }
   0x6   : > { %p33_p0 = scmp.ge.s32.totalorder %s31_s29, 3  ;;  %p212_p1 = scmp.ne.s32.totalorder %s2648_s23, %s2644_s22 }
   0x7   : > { %p213_p2 = scmp.eq.s32.totalorder %s2305_s27, 2  ;;  %p218_p3 = scmp.ne.s32.totalorder %s2644_s22, %s2640_s21 }
   0x8   : > { %s4782_s29 = smov (%p33_p0, %s31_s29), 0  ;;  %p219_p5 = scmp.eq.s32.totalorder %s2306_s28, 2 }
   0x9   : > { %p2740_p4 = por %p213_p2, %p212_p1  ;;  %s197_s8 = ssub.s32 %s2656_s25, %s4782_s29 }
   0xa   : > { %p2309_p6 = scmp.ge.s32.totalorder %s2660_s26, 1  ;;  %p200_p7 = scmp.eq.s32.totalorder %s197_s8, 0 }
   0xb   : > { %p2747_p8 = por %p219_p5, %p218_p3  ;;  %p296_p9 = scmp.lt.s32.totalorder %s2660_s26, 4 }
   0xc   : > { %s2753_s10 = scalar_select %p200_p7, %s2648_s23, %s202_s30  }
   0xd   : > { %p297_p10 = pnand %p2309_p6, %p296_p9 }
   0xf   : > { %300 = sbr.rel (%p297_p10) target bundleno = 951 (0x3b7), region = 44 }
  0x14   : > { %p360_p11 = scmp.lt.s32.totalorder %s2652_s24, 2  ;;  %v4643_v0 = vmov 0   ;;  %v2663_v49 = vmov 1   ;;  %v4641_v51 = vmov 2   ;;  %s2320_s20 = sshll.u32 %s2652_s24, 2 }
  0x15   : > { %2386 = vset.pattern.permute.xlu2 %v4643_v0  ;;  %2385 = vset.pattern.permute.xlu1 %v4643_v0  ;;  %s2157_s30 = scalar_lea.hbm %s4640_s6, %s2320_s20 }
  0x16   : > { %2384 = vset.pattern.permute.xlu0 %v4643_v0  ;;  %s2760_s11 = scalar_select %p360_p11, %s2652_s24, 2 }
  0x17   : > { %s2161_s13 = sshll.u32 %s2157_s30, 4  ;;  %s2162_s13 = int_to_ptr.hbm [resolvable:$true] %s2161_s13 }
  0x18   : > { %s2763_s12 = sshll.u32 %s2760_s11, 7  ;;  %s2788_s27 = scalar_lea.vmem %s4639_s5, %s2760_s11 }
  0x19   : > { %s2769_s15 = scalar_lea.vmem %s4634_s0, %s2763_s12  ;;  %s2775_s18 = scalar_lea.vmem %s4635_s1, %s2763_s12 }
  0x1a   : > { %v2778_v1 = vld [vmem:[%s2769_s15 + $0x20] sm:$0xff]  ;;  %v2782_v3 = vld [vmem:[%s2769_s15 + $0x10] sm:$0xff]  ;;  %v2806_v10 = vld [vmem:[%s2769_s15 + $0x28] sm:$0xff]  ;;  %s2920_s8 = scalar_lea.vmem %s4638_s4, %s2763_s12  ;;  %s2315_s12 = sshll.u32 %s2760_s11, 2 }
  0x1b   : > { %v420_v2 = vld [vmem:[%s2775_s18 + $0x20] sm:$0xff]  ;;  %v418_v5 = vld [vmem:[%s2775_s18 + $0x10] sm:$0xff]  ;;  %v421_v11 = vld [vmem:[%s2775_s18 + $0x28] sm:$0xff]  ;;  %s2950_s16 = scalar_lea.vmem %s4636_s2, %s2315_s12  ;;  %s386_s19 = scalar_lea.vmem %s4637_s3, %s2315_s12 }
  0x1c   : > { %v2791_v4 = vadd.f32 %v420_v2, %v2778_v1  ;;  %v2796_v6 = vadd.f32 %v418_v5, %v2782_v3  ;;  %v2799_v7 = vld [vmem:[%s2769_s15] sm:$0xff]  ;;  %v2812_v12 = vld [vmem:[%s2769_s15 + $0x18] sm:$0xff]  ;;  %v2816_v14 = vadd.f32 %v421_v11, %v2806_v10  ;;  %v2819_v15 = vld [vmem:[%s2769_s15 + $0x8] sm:$0xff]  ;;  %s356_s11 = sand.u32 1, %s2644_s22   ;;  %s2596_s17 = sshra.s32 %s2162_s13, 4  ;;  %s2597_s17 = int_to_ptr.hbm [resolvable:$true] %s2596_s17 }
  0x1d   : > { %v416_v8 = vld [vmem:[%s2775_s18] sm:$0xff]  ;;  %v419_v13 = vld [vmem:[%s2775_s18 + $0x18] sm:$0xff]  ;;  %v417_v16 = vld [vmem:[%s2775_s18 + $0x8] sm:$0xff]  ;;  %s2146_s14 = scalar_lea.sflag [#allocation3], %s356_s11  ;;  %p2603_p1 = scmp.lt.s32.totalorder %s2597_s17, %s4640_s6 }
  0x1e   : > { %489 = vperm.xlu2 %2386, %v2791_v4   ;;  %v2803_v9 = vadd.f32 %v416_v8, %v2799_v7  ;;  %479 = vperm.xlu1 %2385, %v2796_v6   ;;  %v2823_v17 = vadd.f32 %v419_v13, %v2812_v12  ;;  %v2826_v18 = vadd.f32 %v417_v16, %v2819_v15  ;;  %v2830_v19 = vld [vmem:[%s2769_s15 + $0x40] sm:$0xff]  ;;  %v2836_v21 = vld [vmem:[%s2769_s15 + $0x38] sm:$0xff]  ;;  %v2843_v24 = vld [vmem:[%s2769_s15 + $0x30] sm:$0xff] }
  0x1f   : > { %v424_v20 = vld [vmem:[%s2775_s18 + $0x40] sm:$0xff]  ;;  %v423_v22 = vld [vmem:[%s2775_s18 + $0x38] sm:$0xff]  ;;  %v422_v25 = vld [vmem:[%s2775_s18 + $0x30] sm:$0xff] }
  0x20   : > { %469 = vperm.xlu0 %2384, %v2803_v9   ;;  %v2840_v23 = vadd.f32 %v424_v20, %v2830_v19  ;;  %v2847_v26 = vadd.f32 %v423_v22, %v2836_v21  ;;  %v2850_v27 = vadd.f32 %v422_v25, %v2843_v24  ;;  %v2854_v28 = vld [vmem:[%s2769_s15 + $0x58] sm:$0xff]  ;;  %v2860_v30 = vld [vmem:[%s2769_s15 + $0x50] sm:$0xff]  ;;  %v2867_v33 = vld [vmem:[%s2769_s15 + $0x48] sm:$0xff] }
  0x21   : > { %v427_v29 = vld [vmem:[%s2775_s18 + $0x58] sm:$0xff]  ;;  %v426_v31 = vld [vmem:[%s2775_s18 + $0x50] sm:$0xff]  ;;  %v425_v34 = vld [vmem:[%s2775_s18 + $0x48] sm:$0xff] }
  0x22   : > { %v2864_v32 = vadd.f32 %v427_v29, %v2854_v28  ;;  %v461_v35 = vadd.f32 %v426_v31, %v2860_v30  ;;  %v460_v36 = vadd.f32 %v425_v34, %v2867_v33  ;;  %v2874_v37 = vld [vmem:[%s2769_s15 + $0x70] sm:$0xff]  ;;  %v2878_v39 = vld [vmem:[%s2769_s15 + $0x68] sm:$0xff]  ;;  %v2885_v42 = vld [vmem:[%s2769_s15 + $0x60] sm:$0xff] }
  0x23   : > { %v430_v38 = vld [vmem:[%s2775_s18 + $0x70] sm:$0xff]  ;;  %v429_v40 = vld [vmem:[%s2775_s18 + $0x68] sm:$0xff]  ;;  %v428_v43 = vld [vmem:[%s2775_s18 + $0x60] sm:$0xff] }
  0x24   : > { %v2882_v41 = vadd.f32 %v430_v38, %v2874_v37  ;;  %v464_v44 = vadd.f32 %v429_v40, %v2878_v39  ;;  %v463_v45 = vadd.f32 %v428_v43, %v2885_v42  ;;  %v2892_v46 = vld [vmem:[%s2769_s15 + $0x78] sm:$0xff]  ;;  %v446_v50 = vld [vmem:[%s2920_s8 + $0x60] sm:$0xff] }
  0x25   : > { %v431_v47 = vld [vmem:[%s2775_s18 + $0x78] sm:$0xff]  ;;  %v2955_v59 = vld [vmem:[%s2950_s16] sm:$0x7] }
  0x26   : > { %494 = vperm.xlu2 %2386, %v2816_v14   ;;  %484 = vperm.xlu1 %2385, %v2823_v17   ;;  %v2896_v48 = vadd.f32 %v431_v47, %v2892_v46  ;;  %v2960_v62 = vperm.slane %v2955_v59, 0  ;;  %v2963_v63 = vperm.slane %v2955_v59, 1 }
  0x28   : > { %474 = vperm.xlu0 %2384, %v2826_v18  }
  0x2e   : > { %509 = vperm.xlu2 %2386, %v2840_v23   ;;  %504 = vperm.xlu1 %2385, %v2847_v26  }
  0x30   : > { %499 = vperm.xlu0 %2384, %v2850_v27  }
  0x36   : > { %524 = vperm.xlu2 %2386, %v2864_v32   ;;  %519 = vperm.xlu1 %2385, %v461_v35  }
  0x38   : > { %514 = vperm.xlu0 %2384, %v460_v36  }
  0x3e   : > { %539 = vperm.xlu2 %2386, %v2882_v41   ;;  %534 = vperm.xlu1 %2385, %v464_v44  }
  0x40   : > { %529 = vperm.xlu0 %2384, %v463_v45  }
  0x46   : > { %2388 = vset.pattern.permute.xlu2 %v2663_v49  ;;  %2387 = vset.pattern.permute.xlu1 %v2663_v49 }
  0x47   : > { %585 = vperm.xlu2 %2388, %v2826_v18   ;;  %581 = vperm.xlu1 %2387, %v2803_v9  }
  0x48   : > { %544 = vperm.xlu0 %2384, %v2896_v48  }
  0x4f   : > { %597 = vperm.xlu2 %2388, %v2791_v4   ;;  %593 = vperm.xlu1 %2387, %v2823_v17  }
  0x50   : > { %1021 = vperm.xlu0 %2384, %v2819_v15  }
  0x57   : > { %605 = vperm.xlu2 %2388, %v2850_v27   ;;  %601 = vperm.xlu1 %2387, %v2816_v14  }
  0x58   : > { %1046 = vperm.xlu0 %2384, %v2843_v24  }
  0x5f   : > { %617 = vperm.xlu2 %2388, %v460_v36   ;;  %613 = vperm.xlu1 %2387, %v2840_v23  }
  0x60   : > { %1061 = vperm.xlu0 %2384, %v2867_v33  }
  0x67   : > { %629 = vperm.xlu2 %2388, %v463_v45   ;;  %625 = vperm.xlu1 %2387, %v2864_v32  }
  0x68   : > { %1076 = vperm.xlu0 %2384, %v2885_v42  }
  0x6f   : > { %641 = vperm.xlu2 %2388, %v2896_v48   ;;  %637 = vperm.xlu1 %2387, %v2882_v41  }
  0x70   : > { %1091 = vperm.xlu0 %2384, %v2892_v46  }
  0x77   : > { %2390 = vset.pattern.permute.xlu2 %v4641_v51  ;;  %2389 = vset.pattern.permute.xlu1 %v4641_v51 }
  0x78   : > { %v2924_v52 = vpop.permute.xlu2 %489  ;;  %702 = vperm.xlu2 %2390, %v2796_v6   ;;  %1623 = vperm.xlu0 %2384, %v446_v50  }
  0x79   : > { %698 = vperm.xlu1 %2389, %v2826_v18  }
  0x80   : > { %v2929_v53 = vpop.permute.xlu2 %494  ;;  %710 = vperm.xlu2 %2390, %v2791_v4   ;;  %2403 = vset.pattern.permute.xlu0 %v2663_v49 }
  0x81   : > { %589 = vperm.xlu0 %2403, %v2796_v6   ;;  %706 = vperm.xlu1 %2389, %v2823_v17  }
  0x88   : > { %v2935_v54 = vpop.permute.xlu2 %509  ;;  %722 = vperm.xlu2 %2390, %v2847_v26  }
  0x89   : > { %609 = vperm.xlu0 %2403, %v2847_v26   ;;  %718 = vperm.xlu1 %2389, %v2850_v27  }
  0x90   : > { %v2940_v55 = vpop.permute.xlu2 %524  ;;  %734 = vperm.xlu2 %2390, %v461_v35   ;;  %v2942_v56 = vpop.permute.xlu1 %479 }
  0x91   : > { %621 = vperm.xlu0 %2403, %v461_v35   ;;  %730 = vperm.xlu1 %2389, %v460_v36  }
  0x92   : > { %v470_v57 = vpop.permute.xlu0 %469 }
  0x93   : > { %v548_v40 = vsub.f32 %v470_v57, %v2960_v62 }
  0x98   : > { %v2952_v58 = vpop.permute.xlu2 %539  ;;  %746 = vperm.xlu2 %2390, %v464_v44   ;;  %v2957_v60 = vpop.permute.xlu1 %484 }
  0x99   : > { %633 = vperm.xlu0 %2403, %v464_v44   ;;  %742 = vperm.xlu1 %2389, %v463_v45  }
  0x9a   : > { %v475_v61 = vpop.permute.xlu0 %474 }
  0x9b   : > { %v549_v2 = vsub.f32 %v475_v61, %v2960_v62  ;;  %v564_v61 = vmul.f32 %v548_v40, %v548_v40 }
  0x9d   : > { %v565_v5 = vmul.f32 %v549_v2, %v549_v2 }
  0xa0   : > { %2391 = vset.pattern.permute.xlu2 %v4643_v0  ;;  %v2969_v6 = vpop.permute.xlu1 %504 }
  0xa1   : > { %v586_v4 = vpop.permute.xlu2 %585  ;;  %1016 = vperm.xlu2 %2391, %v2799_v7   ;;  %1136 = vperm.xlu0 %2403, %v2782_v3  }
  0xa2   : > { %754 = vperm.xlu1 %2389, %v2896_v48   ;;  %v646_v8 = vsub.f32 %v586_v4, %v2963_v63  ;;  %v500_v11 = vpop.permute.xlu0 %499 }
  0xa3   : > { %v554_v22 = vsub.f32 %v500_v11, %v2960_v62 }
  0xa4   : > { %v662_v13 = vmul.f32 %v646_v8, %v646_v8 }
  0xa5   : > { %v570_v26 = vmul.f32 %v554_v22, %v554_v22 }
  0xa6   : > { %v2973_v16 = vadd.f32 %v662_v13, %v565_v5 }
  0xa8   : > { %v2979_v18 = vpop.permute.xlu1 %519 }
  0xa9   : > { %v2975_v17 = vpop.permute.xlu2 %597  ;;  %1031 = vperm.xlu2 %2391, %v2812_v12   ;;  %1184 = vperm.xlu0 %2403, %v2874_v37  }
  0xaa   : > { %2392 = vset.pattern.permute.xlu1 %v4643_v0  ;;  %v515_v20 = vpop.permute.xlu0 %514 }
  0xab   : > { %1026 = vperm.xlu1 %2392, %v2782_v3   ;;  %v557_v36 = vsub.f32 %v515_v20, %v2960_v62 }
  0xad   : > { %v573_v47 = vmul.f32 %v557_v36, %v557_v36 }
  0xb0   : > { %v2986_v27 = vpop.permute.xlu1 %534 }
  0xb1   : > { %v606_v25 = vpop.permute.xlu2 %605  ;;  %1041 = vperm.xlu2 %2391, %v2806_v10   ;;  %1172 = vperm.xlu0 %2403, %v2854_v28  }
  0xb2   : > { %v651_v29 = vsub.f32 %v606_v25, %v2963_v63  ;;  %v530_v31 = vpop.permute.xlu0 %529 }
  0xb3   : > { %1036 = vperm.xlu1 %2392, %v2778_v1   ;;  %v560_v5 = vsub.f32 %v530_v31, %v2960_v62 }
  0xb4   : > { %v667_v34 = vmul.f32 %v651_v29, %v651_v29 }
  0xb5   : > { %v576_v22 = vmul.f32 %v560_v5, %v560_v5 }
  0xb6   : > { %v2990_v35 = vadd.f32 %v667_v34, %v570_v26 }
  0xb9   : > { %v618_v38 = vpop.permute.xlu2 %617  ;;  %1056 = vperm.xlu2 %2391, %v2830_v19   ;;  %1152 = vperm.xlu0 %2403, %v2843_v24   ;;  %v582_v45 = vpop.permute.xlu1 %581 }
  0xba   : > { %v654_v43 = vsub.f32 %v618_v38, %v2963_v63  ;;  %v545_v44 = vpop.permute.xlu0 %544  ;;  %v645_v50 = vsub.f32 %v582_v45, %v2963_v63 }
  0xbb   : > { %1051 = vperm.xlu1 %2392, %v2836_v21   ;;  %v563_v29 = vsub.f32 %v545_v44, %v2960_v62 }
  0xbc   : > { %v670_v48 = vmul.f32 %v654_v43, %v654_v43  ;;  %v661_v4 = vmul.f32 %v645_v50, %v645_v50  ;;  %v3040_v50 = vperm.slane %v2955_v59, 2 }
  0xbd   : > { %v579_v38 = vmul.f32 %v563_v29, %v563_v29 }
  0xbe   : > { %v2999_v2 = vadd.f32 %v670_v48, %v573_v47  ;;  %v3002_v8 = vadd.f32 %v661_v4, %v564_v61  ;;  %v649_v47 = vsub.f32 %v2975_v17, %v2963_v63  ;;  %v552_v48 = vsub.f32 %v2924_v52, %v2960_v62 }
  0xc0   : > { %v568_v4 = vmul.f32 %v552_v48, %v552_v48 }
  0xc1   : > { %v630_v57 = vpop.permute.xlu2 %629  ;;  %1071 = vperm.xlu2 %2391, %v2854_v28   ;;  %2408 = vset.pattern.permute.xlu0 %v4641_v51  ;;  %v3011_v20 = vpop.permute.xlu1 %593 }
  0xc2   : > { %v657_v11 = vsub.f32 %v630_v57, %v2963_v63  ;;  %694 = vperm.xlu0 %2408, %v2803_v9   ;;  %v3008_v13 = vpop.permute.xlu0 %1021 }
  0xc3   : > { %1066 = vperm.xlu1 %2392, %v2860_v30  }
  0xc4   : > { %v673_v25 = vmul.f32 %v657_v11, %v657_v11 }
  0xc6   : > { %v3013_v26 = vadd.f32 %v673_v25, %v576_v22 }
  0xc9   : > { %v642_v31 = vpop.permute.xlu2 %641  ;;  %1086 = vperm.xlu2 %2391, %v2874_v37   ;;  %v3022_v36 = vpop.permute.xlu1 %601 }
  0xca   : > { %v660_v34 = vsub.f32 %v642_v31, %v2963_v63  ;;  %714 = vperm.xlu0 %2408, %v2816_v14   ;;  %v3019_v9 = vpop.permute.xlu0 %1046 }
  0xcb   : > { %1081 = vperm.xlu1 %2392, %v2878_v39  }
  0xcc   : > { %v676_v40 = vmul.f32 %v660_v34, %v660_v34 }
  0xce   : > { %v3024_v43 = vadd.f32 %v676_v40, %v579_v38 }
  0xd1   : > { %2394 = vset.pattern.permute.xlu2 %v2663_v49  ;;  %v3032_v14 = vpop.permute.xlu1 %613 }
  0xd2   : > { %v703_v44 = vpop.permute.xlu2 %702  ;;  %1132 = vperm.xlu2 %2394, %v2819_v15   ;;  %726 = vperm.xlu0 %2408, %v2840_v23   ;;  %v3029_v45 = vpop.permute.xlu0 %1061  ;;  %v665_v15 = vmul.f32 %v649_v47, %v649_v47  ;;  %v559_v23 = vsub.f32 %v2940_v55, %v2960_v62 }
  0xd3   : > { %2393 = vset.pattern.permute.xlu1 %v2663_v49 }
  0xd4   : > { %1128 = vperm.xlu1 %2393, %v2799_v7   ;;  %v681_v59 = vadd.f32 %v665_v15, %v568_v4  ;;  %v575_v11 = vmul.f32 %v559_v23, %v559_v23  ;;  %v648_v23 = vsub.f32 %v3011_v20, %v2963_v63  ;;  %v551_v4 = vsub.f32 %v2957_v60, %v2960_v62 }
  0xd5   : > { %v760_v60 = vsub.f32 %v703_v44, %v3040_v50 }
  0xd6   : > { %v567_v20 = vmul.f32 %v551_v4, %v551_v4 }
  0xd9   : > { %v626_v5 = vpop.permute.xlu1 %625 }
  0xda   : > { %v711_v61 = vpop.permute.xlu2 %710  ;;  %1144 = vperm.xlu2 %2394, %v2778_v1   ;;  %738 = vperm.xlu0 %2408, %v2864_v32   ;;  %v3046_v7 = vpop.permute.xlu0 %1076  ;;  %v656_v52 = vsub.f32 %v626_v5, %v2963_v63  ;;  %v562_v32 = vsub.f32 %v2952_v58, %v2960_v62 }
  0xdb   : > { %v762_v17 = vsub.f32 %v711_v61, %v3040_v50 }
  0xdc   : > { %1140 = vperm.xlu1 %2393, %v2812_v12   ;;  %v672_v22 = vmul.f32 %v656_v52, %v656_v52  ;;  %v578_v40 = vmul.f32 %v562_v32, %v562_v32  ;;  %v550_v52 = vsub.f32 %v2942_v56, %v2960_v62 }
  0xdd   : > { %v778_v57 = vmul.f32 %v762_v17, %v762_v17 }
  0xde   : > { %v3053_v25 = vadd.f32 %v672_v22, %v575_v11  ;;  %v566_v56 = vmul.f32 %v550_v52, %v550_v52 }
  0xdf   : > { %v3051_v55 = vadd.f32 %v778_v57, %v681_v59  ;;  %v449_v59 = vld [vmem:[%s2920_s8 + $0x78] sm:$0xff] }
  0xe1   : > { %4671 = vst [vmem:[#allocation5_spill] sm:$0xff] %v3051_v55  ;;  %v638_v34 = vpop.permute.xlu1 %637 }
  0xe2   : > { %v723_v29 = vpop.permute.xlu2 %722  ;;  %2395 = vset.pattern.permute.xlu2 %v4641_v51  ;;  %750 = vperm.xlu0 %2408, %v2882_v41   ;;  %v3059_v31 = vpop.permute.xlu0 %1091  ;;  %v659_v38 = vsub.f32 %v638_v34, %v2963_v63 }
  0xe3   : > { %1301 = vperm.xlu2 %2395, %v2892_v46   ;;  %v765_v52 = vsub.f32 %v723_v29, %v3040_v50  ;;  %v558_v29 = vsub.f32 %v2979_v18, %v2960_v62 }
  0xe4   : > { %1188 = vperm.xlu1 %2393, %v2892_v46   ;;  %v675_v47 = vmul.f32 %v659_v38, %v659_v38  ;;  %v776_v38 = vmul.f32 %v760_v60, %v760_v60 }
  0xe6   : > { %v3064_v48 = vadd.f32 %v675_v47, %v578_v40 }
  0xea   : > { %v3066_v15 = vpop.permute.xlu2 %734  ;;  %1293 = vperm.xlu0 %2408, %v2878_v39   ;;  %v3069_v58 = vpop.permute.xlu0 %1623 }
  0xeb   : > { %2397 = vset.pattern.permute.xlu2 %v2663_v49  ;;  %v699_v41 = vpop.permute.xlu1 %698 }
  0xec   : > { %2396 = vset.pattern.permute.xlu1 %v4641_v51  ;;  %1180 = vperm.xlu2 %2397, %v2878_v39   ;;  %v759_v46 = vsub.f32 %v699_v41, %v3040_v50  ;;  %v664_v39 = vmul.f32 %v648_v23, %v648_v23  ;;  %v448_v41 = vld [vmem:[%s2920_s8 + $0x70] sm:$0xff] }
  0xed   : > { %1297 = vperm.xlu1 %2396, %v2874_v37  }
  0xee   : > { %v775_v61 = vmul.f32 %v759_v46, %v759_v46  ;;  %v680_v22 = vadd.f32 %v664_v39, %v567_v20  ;;  %v555_v46 = vsub.f32 %v2969_v6, %v2960_v62 }
  0xf0   : > { %v3081_v5 = vadd.f32 %v775_v61, %v2973_v16  ;;  %v571_v6 = vmul.f32 %v555_v46, %v555_v46 }
  0xf2   : > { %4672 = vst [vmem:[#allocation6_spill] sm:$0xff] %v3081_v5  ;;  %v3083_v17 = vpop.permute.xlu2 %746  ;;  %1273 = vperm.xlu0 %2408, %v2830_v19  }
  0xf3   : > { %v590_v37 = vpop.permute.xlu0 %589  ;;  %v707_v57 = vpop.permute.xlu1 %706 }
  0xf4   : > { %1176 = vperm.xlu2 %2397, %v2885_v42   ;;  %v647_v16 = vsub.f32 %v590_v37, %v2963_v63  ;;  %v761_v11 = vsub.f32 %v707_v57, %v3040_v50  ;;  %v781_v57 = vmul.f32 %v765_v52, %v765_v52  ;;  %v436_v52 = vld [vmem:[%s2920_s8 + $0x10] sm:$0xff] }
  0xf5   : > { %2398 = vset.pattern.permute.xlu1 %v4643_v0 }
  0xf6   : > { %1638 = vperm.xlu1 %2398, %v449_v59   ;;  %v663_v32 = vmul.f32 %v647_v16, %v647_v16  ;;  %v777_v34 = vmul.f32 %v761_v11, %v761_v11  ;;  %v441_v16 = vld [vmem:[%s2920_s8 + $0x38] sm:$0xff]  ;;  %v447_v11 = vld [vmem:[%s2920_s8 + $0x68] sm:$0xff] }
  0xf8   : > { %v679_v40 = vadd.f32 %v663_v32, %v566_v56  ;;  %v3094_v47 = vadd.f32 %v777_v34, %v680_v22  ;;  %v768_v34 = vsub.f32 %v3066_v15, %v3040_v50 }
  0xfa   : > { %4673 = vst [vmem:[#allocation7_spill] sm:$0xff] %v3094_v47  ;;  %v3099_v44 = vadd.f32 %v776_v38, %v679_v40  ;;  %1249 = vperm.xlu0 %2408, %v2782_v3   ;;  %v574_v40 = vmul.f32 %v558_v29, %v558_v29  ;;  %v784_v46 = vmul.f32 %v768_v34, %v768_v34 }
  0xfb   : > { %v3102_v23 = vpop.permute.xlu2 %1016  ;;  %v610_v61 = vpop.permute.xlu0 %609 }
  0xfc   : > { %v719_v4 = vpop.permute.xlu1 %718  ;;  %2400 = vset.pattern.permute.xlu2 %v4643_v0  ;;  %v652_v39 = vsub.f32 %v610_v61, %v2963_v63  ;;  %2418 = vrsqrt.f32 %v3099_v44  ;;  %vm837_vm4 = vcmp.eq.f32.partialorder %v3099_v44, inf  ;;  %vm839_vm5 = vcmp.eq.f32.partialorder %v3099_v44, 0.0 }
  0xfd   : > { %v764_v59 = vsub.f32 %v719_v4, %v3040_v50  ;;  %1633 = vperm.xlu2 %2400, %v448_v41  }
  0xfe   : > { %2399 = vset.pattern.permute.xlu1 %v4641_v51  ;;  %v668_v37 = vmul.f32 %v652_v39, %v652_v39  ;;  %v561_v39 = vsub.f32 %v2986_v27, %v2960_v62 }
  0xff   : > { %v780_v3 = vmul.f32 %v764_v59, %v764_v59  ;;  %1289 = vperm.xlu1 %2399, %v2885_v42  }
 0x100   : > { %v684_v20 = vadd.f32 %v668_v37, %v571_v6  ;;  %v577_v27 = vmul.f32 %v561_v39, %v561_v39 }
 0x101   : > { %v3111_v60 = vadd.f32 %v780_v3, %v2990_v35 }
 0x102   : > { %v3117_v56 = vadd.f32 %v781_v57, %v684_v20  ;;  %2413 = vset.pattern.permute.xlu0 %v4643_v0 }
 0x103   : > { %4674 = vst [vmem:[#allocation8_spill] sm:$0xff] %v3111_v60  ;;  %v3120_v22 = vpop.permute.xlu2 %1031  ;;  %1598 = vperm.xlu0 %2413, %v441_v16   ;;  %v622_v32 = vpop.permute.xlu0 %621 }
 0x104   : > { %4675 = vst [vmem:[#allocation9_spill] sm:$0xff] %v3117_v56  ;;  %v731_v42 = vpop.permute.xlu1 %730  ;;  %v655_v35 = vsub.f32 %v622_v32, %v2963_v63 }
 0x105   : > { %v767_v38 = vsub.f32 %v731_v42, %v3040_v50  ;;  %1628 = vperm.xlu2 %2400, %v447_v11  }
 0x106   : > { %v671_v18 = vmul.f32 %v655_v35, %v655_v35 }
 0x107   : > { %v783_v41 = vmul.f32 %v767_v38, %v767_v38  ;;  %1285 = vperm.xlu1 %2399, %v2854_v28   ;;  %v771_v28 = vsub.f32 %v3083_v17, %v3040_v50 }
 0x108   : > { %v687_v61 = vadd.f32 %v671_v18, %v574_v40 }
 0x109   : > { %v3128_v4 = vadd.f32 %v783_v41, %v2999_v2  ;;  %v787_v16 = vmul.f32 %v771_v28, %v771_v28 }
 0x10a   : > { %v3133_v15 = vadd.f32 %v784_v46, %v687_v61 }
 0x10b   : > { %v3135_v59 = vpop.permute.xlu2 %1041  ;;  %1573 = vperm.xlu0 %2413, %v436_v52   ;;  %v634_v6 = vpop.permute.xlu0 %633  ;;  %vm921_vm6 = vcmp.eq.f32.partialorder %v3128_v4, inf  ;;  %vm923_vm7 = vcmp.eq.f32.partialorder %v3128_v4, 0.0 }
 0x10c   : > { %v743_v37 = vpop.permute.xlu1 %742  ;;  %v658_v3 = vsub.f32 %v634_v6, %v2963_v63  ;;  %v445_v6 = vld [vmem:[%s2920_s8 + $0x58] sm:$0xff]  ;;  %vm933_vm10 = vcmp.eq.f32.partialorder %v3133_v15, inf  ;;  %vm935_vm13 = vcmp.eq.f32.partialorder %v3133_v15, 0.0 }
 0x10d   : > { %v770_v2 = vsub.f32 %v743_v37, %v3040_v50  ;;  %2402 = vset.pattern.permute.xlu2 %v4641_v51 }
 0x10e   : > { %1281 = vperm.xlu2 %2402, %v2860_v30   ;;  %v674_v57 = vmul.f32 %v658_v3, %v658_v3 }
 0x10f   : > { %v786_v20 = vmul.f32 %v770_v2, %v770_v2  ;;  %2401 = vset.pattern.permute.xlu1 %v2663_v49 }
 0x110   : > { %1168 = vperm.xlu1 %2401, %v2860_v30   ;;  %v690_v11 = vadd.f32 %v674_v57, %v577_v27  ;;  %v3159_v30 = vld [vmem:[%s386_s19] sm:$0x7]  ;;  %s2602_s19 = scalar_lea.hbm %s4640_s6, 12 }
 0x111   : > { %v3146_v29 = vadd.f32 %v786_v20, %v3013_v26  ;;  %v3162_v38 = vperm.slane %v3159_v30, 1  ;;  %v3169_v41 = vperm.slane %v3159_v30, 0 }
 0x112   : > { %v3148_v17 = vadd.f32 %v787_v16, %v690_v11 }
 0x113   : > { %v3150_v32 = vpop.permute.xlu2 %1056  ;;  %v1137_v42 = vpop.permute.xlu0 %1136  ;;  %4676 = vst [vmem:[#allocation10_spill] sm:$0xff] %v3162_v38  ;;  %vm957_vm14 = vcmp.eq.f32.partialorder %v3146_v29, inf  ;;  %vm959_vm15 = vcmp.eq.f32.partialorder %v3146_v29, 0.0 }
 0x114   : > { %v755_v34 = vpop.permute.xlu1 %754  ;;  %v1194_v46 = vsub.f32 %v1137_v42, %v3162_v38  ;;  %vm969_vm8 = vcmp.eq.f32.partialorder %v3148_v17, inf  ;;  %vm971_vm11 = vcmp.eq.f32.partialorder %v3148_v17, 0.0 }
 0x115   : > { %v773_v35 = vsub.f32 %v755_v34, %v3040_v50  ;;  %v444_v34 = vld [vmem:[%s2920_s8 + $0x50] sm:$0xff] }
 0x116   : > { %1277 = vperm.xlu2 %2402, %v2867_v33  }
 0x117   : > { %v789_v26 = vmul.f32 %v773_v35, %v773_v35 }
 0x118   : > { %1164 = vperm.xlu1 %2401, %v2867_v33   ;;  %v1210_v33 = vmul.f32 %v1194_v46, %v1194_v46 }
 0x119   : > { %v3166_v40 = vadd.f32 %v789_v26, %v3024_v43 }
 0x11b   : > { %v1072_v18 = vpop.permute.xlu2 %1071  ;;  %v1185_v61 = vpop.permute.xlu0 %1184  ;;  %vm993_vm9 = vcmp.eq.f32.partialorder %v3166_v40, inf  ;;  %vm995_vm12 = vcmp.eq.f32.partialorder %v3166_v40, 0.0 }
 0x11c   : > { %v1206_v37 = vsub.f32 %v1185_v61, %v3162_v38  ;;  %v1106_v3 = vsub.f32 %v1072_v18, %v3169_v41  ;;  %v1096_v61 = vsub.f32 %v3008_v13, %v3169_v41 }
 0x11d   : > { %v1027_v52 = vpop.permute.xlu1 %1026 }
 0x11e   : > { %v1097_v39 = vsub.f32 %v1027_v52, %v3169_v41  ;;  %2405 = vset.pattern.permute.xlu2 %v2663_v49  ;;  %v1222_v11 = vmul.f32 %v1206_v37, %v1206_v37  ;;  %v1122_v35 = vmul.f32 %v1106_v3, %v1106_v3 }
 0x11f   : > { %1160 = vperm.xlu2 %2405, %v2830_v19   ;;  %v3184_v19 = vld [vmem:[%s2788_s27] ss:$0 sm:$0xff] }
 0x120   : > { %v1113_v43 = vmul.f32 %v1097_v39, %v1097_v39  ;;  %2404 = vset.pattern.permute.xlu1 %v4643_v0  ;;  %v1656_v52 = vadd.f32 %v3184_v19, %v3069_v58  ;;  %v1101_v39 = vsub.f32 %v3019_v9, %v3169_v41 }
 0x121   : > { %1618 = vperm.xlu1 %2404, %v445_v6  }
 0x122   : > { %v3178_v28 = vadd.f32 %v1210_v33, %v1113_v43 }
 0x123   : > { %v1087_v2 = vpop.permute.xlu2 %1086  ;;  %v1173_v27 = vpop.permute.xlu0 %1172 }
 0x124   : > { %v1109_v57 = vsub.f32 %v1087_v2, %v3169_v41  ;;  %v1203_v20 = vsub.f32 %v1173_v27, %v3162_v38  ;;  %v443_v2 = vld [vmem:[%s2920_s8 + $0x48] sm:$0xff]  ;;  %v1112_v27 = vmul.f32 %v1096_v61, %v1096_v61 }
 0x125   : > { %v1037_v16 = vpop.permute.xlu1 %1036 }
 0x126   : > { %v1125_v42 = vmul.f32 %v1109_v57, %v1109_v57  ;;  %v1219_v26 = vmul.f32 %v1203_v20, %v1203_v20  ;;  %v3203_v57 = vmax.f32 %v1656_v52, 1e-12  ;;  %v1117_v20 = vmul.f32 %v1101_v39, %v1101_v39 }
 0x127   : > { %1156 = vperm.xlu2 %2405, %v2836_v21  }
 0x128   : > { %v3188_v46 = vadd.f32 %v1222_v11, %v1125_v42  ;;  %v3190_v18 = vadd.f32 %v1219_v26, %v1122_v35  ;;  %2420 = vrcp.f32 %v3203_v57  ;;  %v3215_v26 = vpop.eup %2418  ;;  %vm1849_vm0 = vweird.f32 %v3203_v57 }
 0x129   : > { %1613 = vperm.xlu1 %2404, %v444_v34   ;;  %v1099_v34 = vsub.f32 %v1037_v16, %v3169_v41  ;;  %2422 = vrsqrt.f32 %v3128_v4 }
 0x12a   : > { %2424 = vrsqrt.f32 %v3133_v15 }
 0x12b   : > { %v1153_v6 = vpop.permute.xlu0 %1152  ;;  %2426 = vrsqrt.f32 %v3148_v17 }
 0x12c   : > { %v1133_v33 = vpop.permute.xlu2 %1132  ;;  %v1198_v43 = vsub.f32 %v1153_v6, %v3162_v38  ;;  %v442_v6 = vld [vmem:[%s2920_s8 + $0x40] sm:$0xff]  ;;  %2428 = vrsqrt.f32 %v3166_v40 }
 0x12d   : > { %v3199_v37 = vpop.permute.xlu1 %1051  ;;  %v1193_v3 = vsub.f32 %v1133_v33, %v3162_v38  ;;  %2430 = vrsqrt.f32 %v3146_v29 }
 0x12e   : > { %v1214_v13 = vmul.f32 %v1198_v43, %v1198_v43  ;;  %v650_v43 = vsub.f32 %v3022_v36, %v2963_v63  ;;  %2432 = vrsqrt.f32 %v3051_v55 }
 0x12f   : > { %v1209_v11 = vmul.f32 %v1193_v3, %v1193_v3  ;;  %2407 = vset.pattern.permute.xlu2 %v4643_v0  ;;  %v1115_v3 = vmul.f32 %v1099_v34, %v1099_v34  ;;  %2434 = vrsqrt.f32 %v3081_v5 }
 0x130   : > { %1608 = vperm.xlu2 %2407, %v443_v2   ;;  %v3207_v9 = vadd.f32 %v1214_v13, %v1117_v20  ;;  %v3225_v2 = vpop.eup %2420  ;;  %v553_v20 = vsub.f32 %v2929_v53, %v2960_v62  ;;  %v666_v36 = vmul.f32 %v650_v43, %v650_v43  ;;  %2436 = vrsqrt.f32 %v3094_v47 }
 0x131   : > { %v3209_v42 = vadd.f32 %v1209_v11, %v1112_v27  ;;  %2406 = vset.pattern.permute.xlu1 %v4641_v51  ;;  %v831_v27 = vmul.f32 %v3215_v26, %v3099_v44  ;;  %v1845_v34 = vmul.f32 %v3225_v2, %v3203_v57  ;;  %vm1850_vm1 = vweird.f32 %v3225_v2 }
 0x132   : > { %4677 = vst [vmem:[#allocation11_spill] sm:$0xff] %v3207_v9  ;;  %1269 = vperm.xlu1 %2406, %v2836_v21   ;;  %v4682_v9 = vmov 0   ;;  %vm3313_vm2 = vmor %vm1849_vm0, %vm1850_vm1 }
 0x133   : > { %4678 = vst [vmem:[#allocation12_spill] sm:$0xff] %v3209_v42 }
 0x134   : > { %v1145_v35 = vpop.permute.xlu2 %1144  ;;  %v695_v61 = vpop.permute.xlu0 %694 }
 0x135   : > { %v3217_v52 = vpop.permute.xlu1 %1066  ;;  %v1196_v39 = vsub.f32 %v1145_v35, %v3162_v38  ;;  %v758_v33 = vsub.f32 %v695_v61, %v3040_v50  ;;  %v832_v35 = vmul.f32 %v3215_v26, %v831_v27  ;;  %v3240_v61 = vpop.eup %2422  ;;  %v1107_v27 = vsub.f32 %v3046_v7, %v3169_v41 }
 0x137   : > { %v1212_v21 = vmul.f32 %v1196_v39, %v1196_v39  ;;  %v774_v16 = vmul.f32 %v758_v33, %v758_v33  ;;  %v569_v39 = vmul.f32 %v553_v20, %v553_v20 }
 0x138   : > { %1603 = vperm.xlu2 %2407, %v442_v6   ;;  %v653_v6 = vsub.f32 %v3032_v14, %v2963_v63  ;;  %v833_v14 = vmul.f32 0.5, %v832_v35  ;;  %v3271_v35 = vperm.slane %v3159_v30, 2  ;;  %v1110_v30 = vsub.f32 %v3059_v31, %v3169_v41 }
 0x139   : > { %v3231_v13 = vadd.f32 %v1212_v21, %v1115_v3  ;;  %v3234_v11 = vadd.f32 %v774_v16, %v3002_v8  ;;  %v556_v8 = vsub.f32 %v2935_v54, %v2960_v62  ;;  %v682_v3 = vadd.f32 %v666_v36, %v569_v39 }
 0x13a   : > { %1265 = vperm.xlu1 %2406, %v2843_v24   ;;  %v1104_v21 = vsub.f32 %v3029_v45, %v3169_v41  ;;  %v1846_v16 = vsub.f32 1.0, %v1845_v34  ;;  %v915_v54 = vmul.f32 %v3240_v61, %v3128_v4  ;;  %v669_v62 = vmul.f32 %v653_v6, %v653_v6  ;;  %v3268_v34 = vpop.eup %2424 }
 0x13b   : > { %4679 = vst [vmem:[#allocation13_spill] sm:$0xff] %v3231_v13  ;;  %v572_v20 = vmul.f32 %v556_v8, %v556_v8  ;;  %v834_v7 = vsub.f32 1.5, %v833_v14  ;;  %v3307_v13 = vmul.f32 %v1110_v30, %v1110_v30  ;;  %v1098_v30 = vsub.f32 %v3120_v22, %v3169_v41 }
 0x13c   : > { %4680 = vst [vmem:[#allocation14_spill] sm:$0xff] %v3234_v11  ;;  %v715_v53 = vpop.permute.xlu0 %714  ;;  %v1847_v36 = vmul.f32 %v3225_v2, %v1846_v16  ;;  %v3273_v39 = vmul.f32 %v1104_v21, %v1104_v21  ;;  %v916_v6 = vmul.f32 %v3240_v61, %v915_v54  ;;  %v1855_v21 = vand.u32 2147483648, %v3203_v57 }
 0x13d   : > { %v3244_v33 = vpop.permute.xlu1 %1081  ;;  %v763_v24 = vsub.f32 %v715_v53, %v3040_v50  ;;  %v3250_v43 = vpop.permute.xlu2 %1301 }
 0x13e   : > { %v3276_v53 = vpop.eup %2426  ;;  %v1848_v54 = vadd.f32 %v3225_v2, %v1847_v36  ;;  %v917_v0 = vmul.f32 0.5, %v916_v6 }
 0x13f   : > { %v779_v63 = vmul.f32 %v763_v24, %v763_v24  ;;  %v685_v24 = vadd.f32 %v669_v62, %v572_v20 }
 0x140   : > { %2410 = vset.pattern.permute.xlu2 %v4641_v51  ;;  %v963_v51 = vmul.f32 %v3276_v53, %v3148_v17 }
 0x141   : > { %1261 = vperm.xlu2 %2410, %v2806_v10   ;;  %v3263_v45 = vadd.f32 %v779_v63, %v682_v3  ;;  %v3283_v3 = vpop.eup %2428 }
 0x142   : > { %2409 = vset.pattern.permute.xlu1 %v2663_v49  ;;  %v3278_v49 = vmul.f32 %v1107_v27, %v1107_v27  ;;  %v440_v27 = vld [vmem:[%s2920_s8 + $0x30] sm:$0xff]  ;;  %v3297_v20 = vpop.eup %2430  ;;  %v987_v36 = vmul.f32 %v3283_v3, %v3166_v40 }
 0x143   : > { %4681 = vst [vmem:[#allocation15_spill] sm:$0xff] %v3263_v45  ;;  %1148 = vperm.xlu1 %2409, %v2806_v10   ;;  %v1095_v10 = vsub.f32 %v3102_v23, %v3169_v41  ;;  %v1853_v23 = vand.u32 2147483647, %v3203_v57  ;;  %v3320_v6 = vpop.eup %2432 }
 0x144   : > { %v727_v8 = vpop.permute.xlu0 %726  ;;  %4685 = vst [vmem:[#allocation16_spill] sm:$0xff] %v3320_v6  ;;  %v988_v22 = vmul.f32 %v3283_v3, %v987_v36  ;;  %v3346_v36 = vpop.eup %2434 }
 0x145   : > { %v766_v16 = vsub.f32 %v727_v8, %v3040_v50  ;;  %v835_v8 = vmul.f32 %v3215_v26, %v834_v7  ;;  %v1111_v42 = vmul.f32 %v1095_v10, %v1095_v10  ;;  %v1856_v26 = vor.u32 1.1754944e-38, %v1855_v21  ;;  %4688 = vst [vmem:[#allocation18_spill] sm:$0xff] %v3346_v36 }
 0x146   : > { %v1129_v63 = vpop.permute.xlu1 %1128  ;;  %v3290_v14 = vpop.permute.xlu2 %1180  ;;  %v1852_v10 = vsel %vm3313_vm2, %v3225_v2, %v1848_v54  ;;  %v951_v21 = vmul.f32 %v3297_v20, %v3146_v29  ;;  %v918_v2 = vsub.f32 1.5, %v917_v0  ;;  %vm1854_vm3 = vcmp.eq.f32.partialorder %v1853_v23, 8.507059e+37 }
 0x147   : > { %v1192_v62 = vsub.f32 %v1129_v63, %v3162_v38  ;;  %v782_v31 = vmul.f32 %v766_v16, %v766_v16  ;;  %v927_v63 = vmul.f32 %v3268_v34, %v3133_v15  ;;  %v1857_v54 = vsel %vm1854_vm3, %v1856_v26, %v1852_v10 }
 0x148   : > { %v952_v47 = vmul.f32 %v3297_v20, %v951_v21  ;;  %v989_v45 = vmul.f32 0.5, %v988_v22 }
 0x149   : > { %v1208_v55 = vmul.f32 %v1192_v62, %v1192_v62  ;;  %2412 = vset.pattern.permute.xlu2 %v4682_v9  ;;  %v3318_v7 = vadd.f32 %v782_v31, %v685_v24  ;;  %v4687_v62 = vmov 2   ;;  %v964_v24 = vmul.f32 %v3276_v53, %v963_v51 }
 0x14a   : > { %1593 = vperm.xlu2 %2412, %v440_v27   ;;  %v836_v27 = vmul.f32 %v835_v8, %v3099_v44  ;;  %v1114_v51 = vmul.f32 %v1098_v30, %v1098_v30  ;;  %v439_v8 = vld [vmem:[%s2920_s8 + $0x28] sm:$0xff]  ;;  %v3350_v30 = vpop.eup %2436 }
 0x14b   : > { %v3327_v57 = vadd.f32 %v1208_v55, %v1111_v42  ;;  %2411 = vset.pattern.permute.xlu1 %v4687_v62  ;;  %2438 = vrsqrt.f32 %v3318_v7  ;;  %v928_v42 = vmul.f32 %v3268_v34, %v927_v63  ;;  %v965_v26 = vmul.f32 0.5, %v964_v24  ;;  %4689 = vst [vmem:[#allocation19_spill] sm:$0xff] %v3350_v30 }
 0x14c   : > { %1257 = vperm.xlu1 %2411, %v2778_v1   ;;  %v739_v55 = vpop.permute.xlu0 %738  ;;  %v840_v1 = vand.u32 2147483648, %v3099_v44  ;;  %v838_v10 = vsel %vm837_vm4, %v3099_v44, %v836_v27  ;;  %2440 = vrsqrt.f32 %v3117_v56  ;;  %vm909_vm0 = vcmp.eq.f32.partialorder %v3318_v7, inf }
 0x14d   : > { %4686 = vst [vmem:[#allocation17_spill] sm:$0xff] %v3327_v57  ;;  %v769_v31 = vsub.f32 %v739_v55, %v3040_v50  ;;  %v919_v55 = vmul.f32 %v3240_v61, %v918_v2  ;;  %v929_v60 = vmul.f32 0.5, %v928_v42 }
 0x14e   : > { %v1141_v16 = vpop.permute.xlu1 %1140  ;;  %v1177_v5 = vpop.permute.xlu2 %1176  ;;  %v3368_v2 = vsel %vm839_vm5, %v840_v1, %v838_v10 }
 0x14f   : > { %v1195_v0 = vsub.f32 %v1141_v16, %v3162_v38  ;;  %v1204_v23 = vsub.f32 %v1177_v5, %v3162_v38  ;;  %v785_v63 = vmul.f32 %v769_v31, %v769_v31  ;;  %v3353_v16 = vmul.f32 %v1857_v54, %v3069_v58 }
 0x150   : > { %v1103_v5 = vsub.f32 %v3150_v32, %v3169_v41  ;;  %v953_v58 = vmul.f32 0.5, %v952_v47  ;;  %v966_v32 = vsub.f32 1.5, %v965_v26  ;;  %v1320_v31 = vsub.f32 %v3250_v43, %v3271_v35 }
 0x151   : > { %v1211_v6 = vmul.f32 %v1195_v0, %v1195_v0  ;;  %v1220_v57 = vmul.f32 %v1204_v23, %v1204_v23  ;;  %v3358_v21 = vadd.f32 %v785_v63, %v3053_v25  ;;  %v3361_v24 = vpop.eup %2438  ;;  %v3376_v25 = vsub.f32 %v3135_v59, %v3169_v41 }
 0x152   : > { %1588 = vperm.xlu2 %2412, %v439_v8   ;;  %v3379_v22 = vmul.f32 %v1103_v5, %v1103_v5  ;;  %v903_v54 = vmul.f32 %v3361_v24, %v3318_v7  ;;  %v967_v0 = vmul.f32 %v3276_v53, %v966_v32  ;;  %v996_v43 = vand.u32 2147483648, %v3166_v40  ;;  %v3402_v10 = vpop.eup %2440 }
 0x153   : > { %v3363_v61 = vadd.f32 %v1211_v6, %v1114_v51  ;;  %v3366_v27 = vadd.f32 %v1220_v57, %v3278_v49  ;;  %v990_v6 = vsub.f32 1.5, %v989_v45  ;;  %v920_v49 = vmul.f32 %v919_v55, %v3128_v4  ;;  %4691 = vst [vmem:[#allocation21_spill] sm:$0xff] %v3402_v10  ;;  %v438_v55 = vld [vmem:[%s2920_s8 + $0x20] sm:$0xff] }
 0x154   : > { %1253 = vperm.xlu1 %2411, %v2812_v12   ;;  %v751_v44 = vpop.permute.xlu0 %750  ;;  %v930_v57 = vsub.f32 1.5, %v929_v60  ;;  %v924_v12 = vand.u32 2147483648, %v3128_v4  ;;  %v972_v60 = vand.u32 2147483648, %v3148_v17  ;;  %v954_v45 = vsub.f32 1.5, %v953_v58  ;;  %v3907_v10 = vld [vmem:[%s2788_s27] ss:$0 sm:$0xff] }
 0x155   : > { %4690 = vst [vmem:[#allocation20_spill] sm:$0xff] %v3363_v61  ;;  %v1205_v51 = vsub.f32 %v3290_v14, %v3162_v38  ;;  %v991_v8 = vmul.f32 %v3283_v3, %v990_v6  ;;  %v922_v63 = vsel %vm921_vm6, %v3128_v4, %v920_v49  ;;  %v1108_v53 = vsub.f32 %v3244_v33, %v3169_v41 }
 0x156   : > { %v1189_v47 = vpop.permute.xlu1 %1188  ;;  %v931_v26 = vmul.f32 %v3268_v34, %v930_v57  ;;  %v772_v14 = vsub.f32 %v751_v44, %v3040_v50  ;;  %v904_v5 = vmul.f32 %v3361_v24, %v903_v54  ;;  %v1336_v3 = vmul.f32 %v1320_v31, %v1320_v31  ;;  %v2578_v34 = vld [vmem:[%s2769_s15 + $0x8] sm:$0xff] }
 0x157   : > { %v1207_v59 = vsub.f32 %v1189_v47, %v3162_v38  ;;  %v3388_v1 = vpop.permute.xlu2 %1633  ;;  %2442 = vrsqrt.f32 %v3358_v21  ;;  %v955_v33 = vmul.f32 %v3297_v20, %v954_v45  ;;  %v1221_v32 = vmul.f32 %v1205_v51, %v1205_v51 }
 0x158   : > { %v968_v50 = vmul.f32 %v967_v0, %v3148_v17  ;;  %2444 = vrsqrt.f32 %v3234_v11  ;;  %v992_v20 = vmul.f32 %v991_v8, %v3166_v40  ;;  %v932_v6 = vmul.f32 %v931_v26, %v3133_v15 }
 0x159   : > { %v1223_v23 = vmul.f32 %v1207_v59, %v1207_v59  ;;  %v1124_v49 = vmul.f32 %v1108_v53, %v1108_v53  ;;  %v788_v57 = vmul.f32 %v772_v14, %v772_v14  ;;  %v905_v54 = vmul.f32 0.5, %v904_v5 }
 0x15a   : > { %2415 = vset.pattern.permute.xlu2 %v4687_v62  ;;  %v3421_v62 = vsel %vm923_vm7, %v924_v12, %v922_v63  ;;  %v1658_v4 = vadd.f32 %v3184_v19, %v3388_v1  ;;  %v936_v59 = vand.u32 2147483648, %v3133_v15  ;;  %v956_v45 = vmul.f32 %v955_v33, %v3146_v29 }
 0x15b   : > { %v1239_v58 = vadd.f32 %v1223_v23, %v3307_v13  ;;  %1245 = vperm.xlu2 %2415, %v2578_v34   ;;  %v1237_v51 = vadd.f32 %v1221_v32, %v1124_v49  ;;  %v970_v26 = vsel %vm969_vm8, %v3148_v17, %v968_v50  ;;  %v994_v53 = vsel %vm993_vm9, %v3166_v40, %v992_v20 }
 0x15c   : > { %2414 = vset.pattern.permute.xlu1 %v4682_v9  ;;  %v1294_v44 = vpop.permute.xlu0 %1293  ;;  %v934_v14 = vsel %vm933_vm10, %v3133_v15, %v932_v6  ;;  %v906_v34 = vsub.f32 1.5, %v905_v54  ;;  %v1102_v32 = vsub.f32 %v3199_v37, %v3169_v41  ;;  %v3464_v50 = vmax.f32 %v1658_v4, 1e-12 }
 0x15d   : > { %v3425_v13 = vadd.f32 %v1336_v3, %v1239_v58  ;;  %1583 = vperm.xlu1 %2414, %v438_v55   ;;  %v1318_v47 = vsub.f32 %v1294_v44, %v3271_v35  ;;  %v3440_v63 = vpop.eup %2442  ;;  %v3453_v55 = vadd.f32 %v788_v57, %v3064_v48  ;;  %v437_v58 = vld [vmem:[%s2920_s8 + $0x18] sm:$0xff]  ;;  %v2579_v44 = vld [vmem:[%s2769_s15] sm:$0xff]  ;;  %v958_v20 = vsel %vm957_vm14, %v3146_v29, %v956_v45  ;;  %s2310_s15 = sshll.u32 %s356_s11, 2 }
 0x15e   : > { %v3460_v33 = vpop.eup %2444  ;;  %v960_v48 = vand.u32 2147483648, %v3146_v29  ;;  %v1105_v6 = vsub.f32 %v3217_v52, %v3169_v41  ;;  %v3476_v49 = vsel %vm971_vm11, %v972_v60, %v970_v26  ;;  %v939_v37 = vmul.f32 %v3440_v63, %v3358_v21  ;;  %v434_v26 = vld [vmem:[%s2920_s8] sm:$0xff] }
 0x15f   : > { %2446 = vrsqrt.f32 %v3425_v13  ;;  %v1298_v12 = vpop.permute.xlu1 %1297  ;;  %v3433_v31 = vpop.permute.xlu2 %1628  ;;  %v1334_v0 = vmul.f32 %v1318_v47, %v1318_v47  ;;  %v3487_v41 = vsel %vm995_vm12, %v996_v43, %v994_v53  ;;  %v3491_v17 = vsel %vm935_vm13, %v936_v59, %v934_v14 }
 0x160   : > { %v1657_v23 = vadd.f32 %v3184_v19, %v3433_v31  ;;  %v907_v52 = vmul.f32 %v3361_v24, %v906_v34  ;;  %v3496_v60 = vsel %vm959_vm15, %v960_v48, %v958_v20  ;;  %v807_v54 = vmul.f32 %v3460_v33, %v3234_v11 }
 0x161   : > { %v3455_v5 = vadd.f32 %v1334_v0, %v1237_v51  ;;  %v3500_v4 = vmul.f32 %v1102_v32, %v1102_v32  ;;  %v3505_v29 = vmul.f32 %v1105_v6, %v1105_v6  ;;  %v940_v45 = vmul.f32 %v3440_v63, %v939_v37 }
 0x162   : > { %v3457_v3 = vmax.f32 %v1657_v23, 1e-12  ;;  %v908_v32 = vmul.f32 %v907_v52, %v3318_v7  ;;  %v3524_v20 = vmul.f32 %v3460_v33, %v807_v54  ;;  %v1319_v6 = vsub.f32 %v1298_v12, %v3271_v35 }
 0x163   : > { %1241 = vperm.xlu2 %2415, %v2579_v44   ;;  %2448 = vrsqrt.f32 %v3455_v5  ;;  %v3539_v42 = vmul.f32 0.5, %v940_v45  ;;  %vm1540_vm1 = vcmp.eq.f32.partialorder %v3425_v13, inf  ;;  %vm1542_vm2 = vcmp.eq.f32.partialorder %v3425_v13, 0.0 }
 0x164   : > { %2450 = vrcp.f32 %v3457_v3  ;;  %v3481_v47 = vpop.permute.xlu0 %1273  ;;  %v1543_v44 = vand.u32 2147483648, %v3425_v13  ;;  %v3550_v45 = vsel %vm909_vm0, %v3318_v7, %v908_v32  ;;  %vm1516_vm4 = vcmp.eq.f32.partialorder %v3455_v5, inf }
 0x165   : > { %v2447_v57 = vpop.eup %2446  ;;  %1578 = vperm.xlu1 %2414, %v437_v58   ;;  %2452 = vrsqrt.f32 %v3453_v55  ;;  %v435_v58 = vld [vmem:[%s2920_s8 + $0x8] sm:$0xff]  ;;  %v942_v15 = vsub.f32 1.5, %v3539_v42  ;;  %v1869_v42 = vand.u32 2147483648, %v3457_v3  ;;  %vm1863_vm5 = vweird.f32 %v3457_v3  ;;  %s358_s8 = scalar_lea.vmem [#allocation2], %s2310_s15 }
 0x166   : > { %2454 = vrcp.f32 %v3464_v50  ;;  %v1534_v40 = vmul.f32 %v2447_v57, %v3425_v13  ;;  %vm1518_vm6 = vcmp.eq.f32.partialorder %v3455_v5, 0.0  ;;  %vm1877_vm11 = vweird.f32 %v3464_v50  ;;  %s2159_s12 = sshll.u32 %s358_s8, 4  ;;  %s2160_s12 = int_to_ptr.vmem [resolvable:$true] %s2159_s12 }
 0x167   : > { %v1870_v30 = vor.u32 1.1754944e-38, %v1869_v42  ;;  %vm911_vm12 = vcmp.eq.f32.partialorder %v3318_v7, 0.0  ;;  %vm945_vm14 = vcmp.eq.f32.partialorder %v3358_v21, inf }
 0x168   : > { %v3507_v43 = vpop.permute.xlu1 %1638  ;;  %v3510_v59 = vpop.permute.xlu2 %1281  ;;  %v1535_v0 = vmul.f32 %v2447_v57, %v1534_v40 }
 0x169   : > { %v1659_v23 = vadd.f32 %v3184_v19, %v3507_v43  ;;  %v2449_v14 = vpop.eup %2448 }
 0x16a   : > { %v3526_v48 = vpop.eup %2450  ;;  %v1510_v37 = vmul.f32 %v2449_v14, %v3455_v5  ;;  %v1536_v40 = vmul.f32 0.5, %v1535_v0 }
 0x16b   : > { %v3530_v51 = vmax.f32 %v1659_v23, 1e-12  ;;  %2416 = vset.pattern.permute.xlu2 %v4682_v9  ;;  %v3533_v53 = vpop.eup %2452  ;;  %v1859_v54 = vmul.f32 %v3526_v48, %v3457_v3  ;;  %vm1864_vm3 = vweird.f32 %v3526_v48 }
 0x16c   : > { %1563 = vperm.xlu2 %2416, %v434_v26   ;;  %v3541_v12 = vpop.eup %2454  ;;  %v1511_v34 = vmul.f32 %v2449_v14, %v1510_v37  ;;  %v1537_v0 = vsub.f32 1.5, %v1536_v40  ;;  %v1250_v9 = vpop.permute.xlu0 %1249  ;;  %v1335_v26 = vmul.f32 %v1319_v6, %v1319_v6  ;;  %v3561_v24 = vmul.f32 %v3533_v53, %v3453_v55  ;;  %vm3582_vm7 = vmor %vm1863_vm5, %vm1864_vm3 }
 0x16d   : > { %2456 = vrcp.f32 %v3530_v51  ;;  %1568 = vperm.xlu1 %2414, %v435_v58   ;;  %v1860_v23 = vsub.f32 1.0, %v1859_v54  ;;  %v1307_v40 = vsub.f32 %v1250_v9, %v3271_v35  ;;  %v1873_v52 = vmul.f32 %v3541_v12, %v3464_v50 }
 0x16e   : > { %v1512_v8 = vmul.f32 0.5, %v1511_v34  ;;  %v1538_v37 = vmul.f32 %v2447_v57, %v1537_v0  ;;  %v1867_v9 = vand.u32 2147483647, %v3457_v3  ;;  %vm1878_vm9 = vweird.f32 %v3541_v12 }
 0x16f   : > { %v1861_v58 = vmul.f32 %v3526_v48, %v1860_v23  ;;  %v1323_v34 = vmul.f32 %v1307_v40, %v1307_v40  ;;  %v1519_v40 = vand.u32 2147483648, %v3455_v5  ;;  %vm1891_vm13 = vweird.f32 %v3530_v51  ;;  %vm3666_vm3 = vmor %vm1877_vm11, %vm1878_vm9 }
 0x170   : > { %v3556_v54 = vpop.permute.xlu2 %1277  ;;  %v1513_v32 = vsub.f32 1.5, %v1512_v8  ;;  %v1539_v57 = vmul.f32 %v1538_v37, %v3425_v13  ;;  %vm1868_vm8 = vcmp.eq.f32.partialorder %v1867_v9, 8.507059e+37 }
 0x171   : > { %v3565_v6 = vpop.permute.xlu1 %1289  ;;  %v1862_v0 = vadd.f32 %v3526_v48, %v1861_v58  ;;  %v3576_v37 = vadd.f32 %v1323_v34, %v3178_v28  ;;  %v1874_v34 = vsub.f32 1.0, %v1873_v52 }
 0x172   : > { %v1514_v36 = vmul.f32 %v2449_v14, %v1513_v32  ;;  %v1541_v8 = vsel %vm1540_vm1, %v3425_v13, %v1539_v57 }
 0x173   : > { %v2457_v23 = vpop.eup %2456  ;;  %v3588_v3 = vsel %vm1542_vm2, %v1543_v44, %v1541_v8  ;;  %v1866_v28 = vsel %vm3582_vm7, %v3526_v48, %v1862_v0  ;;  %2458 = vrsqrt.f32 %v3576_v37  ;;  %v1897_v44 = vand.u32 2147483648, %v3530_v51 }
 0x174   : > { %v1887_v14 = vmul.f32 %v2457_v23, %v3530_v51  ;;  %v1515_v32 = vmul.f32 %v1514_v36, %v3455_v5  ;;  %v1560_v57 = vsub.f32 0.0, %v3588_v3  ;;  %v1895_v36 = vand.u32 2147483647, %v3530_v51 }
 0x175   : > { %v4694_v48 = vsub.f32 0.0, %v3487_v41  ;;  %v1871_v9 = vsel %vm1868_vm8, %v1870_v30, %v1866_v28  ;;  %vm1892_vm10 = vweird.f32 %v2457_v23  ;;  %v3613_v8 = vadd.f32 %v1335_v26, %v3188_v46  ;;  %v3620_v30 = vpop.permute.xlu0 %1598 }
 0x176   : > { %v1888_v61 = vsub.f32 1.0, %v1887_v14  ;;  %v1517_v13 = vsel %vm1516_vm4, %v3455_v5, %v1515_v32  ;;  %v1313_v14 = vsub.f32 %v3481_v47, %v3271_v35  ;;  %v943_v41 = vmul.f32 %v3440_v63, %v942_v15  ;;  %4695 = vst [vmem:[#allocation22_spill] sm:$0xff] %v3620_v30  ;;  %vm1893_vm15 = vmor %vm1891_vm13, %vm1892_vm10 }
 0x177   : > { %v3607_v0 = vsub.f32 %v4694_v48, %v1560_v57  ;;  %v1520_v52 = vsel %vm1518_vm6, %v1519_v40, %v1517_v13  ;;  %v1875_v47 = vmul.f32 %v3541_v12, %v1874_v34  ;;  %v1913_v40 = vmul.f32 %v1871_v9, %v3433_v31 }
 0x178   : > { %v1889_v42 = vmul.f32 %v2457_v23, %v1888_v61  ;;  %v1558_v58 = vsub.f32 0.0, %v1520_v52  ;;  %v4696_v63 = vsub.f32 0.0, %v3476_v49  ;;  %v1898_v28 = vor.u32 1.1754944e-38, %v1897_v44 }
 0x179   : > { %v1286_v32 = vpop.permute.xlu1 %1285  ;;  %v1161_v11 = vpop.permute.xlu2 %1160  ;;  %vm1896_vm0 = vcmp.eq.f32.partialorder %v1895_v36, 8.507059e+37  ;;  %v4697_v52 = vand.u32 2147483647, %v3464_v50  ;;  %v1651_v31 = vadd.f32 %v3184_v19, %v3620_v30  ;;  %vm947_vm2 = vcmp.eq.f32.partialorder %v3358_v21, 0.0 }
 0x17a   : > { %v1890_v5 = vadd.f32 %v2457_v23, %v1889_v42  ;;  %v1316_v61 = vsub.f32 %v1286_v32, %v3271_v35  ;;  %v1200_v46 = vsub.f32 %v1161_v11, %v3162_v38  ;;  %v2459_v26 = vpop.eup %2458  ;;  %v1929_v15 = vsub.f32 %v4696_v63, %v1558_v58 }
 0x17b   : > { %vm3632_vm1 = vcmp.eq.f32.partialorder %v4697_v52, 8.507059e+37  ;;  %v1378_v49 = vmul.f32 %v2459_v26, %v3576_v37  ;;  %v1329_v44 = vmul.f32 %v1313_v14, %v1313_v14  ;;  %v976_v9 = vmul.f32 %v3533_v53, %v3561_v24 }
 0x17c   : > { %v1894_v51 = vsel %vm1893_vm15, %v2457_v23, %v1890_v5  ;;  %v1332_v13 = vmul.f32 %v1316_v61, %v1316_v61  ;;  %v1216_v48 = vmul.f32 %v1200_v46, %v1200_v46  ;;  %v1945_v42 = vmul.f32 %v1929_v15, %v1913_v40 }
 0x17d   : > { %v1899_v34 = vsel %vm1896_vm0, %v1898_v28, %v1894_v51  ;;  %v1876_v32 = vadd.f32 %v3541_v12, %v1875_v47  ;;  %v1379_v5 = vmul.f32 %v2459_v26, %v1378_v49  ;;  %v944_v46 = vmul.f32 %v943_v41, %v3358_v21 }
 0x17e   : > { %v3641_v23 = vadd.f32 %v1332_v13, %v3190_v18  ;;  %v1232_v36 = vadd.f32 %v1216_v48, %v3379_v22  ;;  %v1961_v61 = vadd.f32 %v1945_v42, %v1558_v58  ;;  %v1915_v40 = vmul.f32 %v1899_v34, %v3507_v43  ;;  %v3691_v34 = vpop.permute.xlu0 %1573 }
 0x17f   : > { %v1317_v63 = vsub.f32 %v3565_v6, %v3271_v35  ;;  %v4700_v22 = vand.u32 2147483648, %v3464_v50  ;;  %v3656_v15 = vmax.f32 %v1651_v31, 1e-12  ;;  %v1380_v24 = vmul.f32 0.5, %v1379_v5 }
 0x180   : > { %2460 = vrsqrt.f32 %v3641_v23  ;;  %v3652_v18 = vadd.f32 %v1329_v44, %v1232_v36  ;;  %v3658_v47 = vmul.f32 100.0, %v1961_v61  ;;  %v4704_v41 = vand.u32 2147483648, %v3318_v7 }
 0x181   : > { %v1884_v14 = vor.u32 1.1754944e-38, %v4700_v22  ;;  %v3660_v58 = vpop.permute.xlu2 %1156  ;;  %v977_v51 = vmul.f32 0.5, %v976_v9  ;;  %v984_v13 = vand.u32 2147483648, %v3453_v55  ;;  %v1880_v50 = vsel %vm3666_vm3, %v3541_v12, %v1876_v32 }
 0x182   : > { %4701 = vst [vmem:[#allocation23_spill] sm:$0xff] %v3658_v47  ;;  %2462 = vrsqrt.f32 %v3652_v18  ;;  %v1169_v6 = vpop.permute.xlu1 %1168  ;;  %v3676_v28 = vsel %vm911_vm12, %v4704_v41, %v3550_v45  ;;  %v1381_v48 = vsub.f32 1.5, %v1380_v24  ;;  %2006 = vmax.xlane.f32.xlu0 %v3658_v47  ;;  %v946_v52 = vsel %vm945_vm14, %v3358_v21, %v944_v46 }
 0x183   : > { %v3687_v42 = vmul.f32 0.5, %v3524_v20  ;;  %2464 = vrsqrt.f32 %v3613_v8  ;;  %v1947_v7 = vmul.f32 %v3607_v0, %v1915_v40  ;;  %v1333_v45 = vmul.f32 %v1317_v63, %v1317_v63 }
 0x184   : > { %v1202_v31 = vsub.f32 %v1169_v6, %v3162_v38  ;;  %v1315_v12 = vsub.f32 %v3510_v59, %v3271_v35  ;;  %2466 = vrcp.f32 %v3656_v15  ;;  %v1382_v49 = vmul.f32 %v2459_v26, %v1381_v48 }
 0x185   : > { %v1006_v44 = vsub.f32 0.0, %v3676_v28  ;;  %v1885_v20 = vsel %vm3632_vm1, %v1884_v14, %v1880_v50  ;;  %v1314_v0 = vsub.f32 %v3556_v54, %v3271_v35  ;;  %v4705_v9 = vand.u32 2147483648, %v3358_v21 }
 0x186   : > { %v2461_v36 = vpop.eup %2460  ;;  %v978_v5 = vsub.f32 1.5, %v977_v51  ;;  %v1383_v59 = vmul.f32 %v1382_v49, %v3576_v37  ;;  %vm1384_vm4 = vcmp.eq.f32.partialorder %v3576_v37, inf  ;;  %v1646_v26 = vadd.f32 %v3184_v19, %v3691_v34 }
 0x187   : > { %v3706_v32 = vsel %vm947_vm2, %v4705_v9, %v946_v52  ;;  %v1486_v11 = vmul.f32 %v2461_v36, %v3641_v23  ;;  %v3716_v54 = vadd.f32 %v1333_v45, %v3366_v27  ;;  %v1387_v46 = vand.u32 2147483648, %v3576_v37 }
 0x188   : > { %v3713_v61 = vpop.eup %2462  ;;  %v1218_v21 = vmul.f32 %v1202_v31, %v1202_v31  ;;  %v1963_v40 = vadd.f32 %v1947_v7, %v1560_v57  ;;  %v1385_v63 = vsel %vm1384_vm4, %v3576_v37, %v1383_v59  ;;  %vm1386_vm5 = vcmp.eq.f32.partialorder %v3576_v37, 0.0 }
 0x189   : > { %v1487_v22 = vmul.f32 %v2461_v36, %v1486_v11  ;;  %v1450_v14 = vmul.f32 %v3713_v61, %v3652_v18  ;;  %v3725_v24 = vpop.eup %2464  ;;  %v3728_v43 = vmul.f32 %v1885_v20, %v3388_v1  ;;  %v1331_v27 = vmul.f32 %v1315_v12, %v1315_v12 }
 0x18a   : > { %v3730_v6 = vsel %vm1386_vm5, %v1387_v46, %v1385_v63  ;;  %v1165_v41 = vpop.permute.xlu1 %1164  ;;  %v3732_v51 = vpop.permute.xlu2 %1608  ;;  %v979_v3 = vmul.f32 %v3533_v53, %v978_v5  ;;  %vm981_vm6 = vcmp.eq.f32.partialorder %v3453_v55, inf  ;;  %v3739_v50 = vmax.f32 %v1646_v26, 1e-12 }
 0x18b   : > { %4706 = vst [vmem:[#allocation24_spill] sm:$0xff] %v3730_v6  ;;  %v3736_v37 = vpop.eup %2466  ;;  %v4658_v57 = vsub.f32 0.0, %v3730_v6  ;;  %v1201_v48 = vsub.f32 %v1165_v41, %v3162_v38  ;;  %v1009_v1 = vsub.f32 0.0, %v3706_v32  ;;  %v1330_v52 = vmul.f32 %v1314_v0, %v1314_v0 }
 0x18c   : > { %v1234_v7 = vadd.f32 %v1218_v21, %v3505_v29  ;;  %v1653_v45 = vadd.f32 %v3184_v19, %v3732_v51  ;;  %v1488_v31 = vmul.f32 0.5, %v1487_v22  ;;  %2468 = vrsqrt.f32 %v3716_v54 }
 0x18d   : > { %v4707_v53 = vsub.f32 0.0, %v3368_v2  ;;  %v1217_v49 = vmul.f32 %v1201_v48, %v1201_v48  ;;  %v1451_v20 = vmul.f32 %v3713_v61, %v1450_v14  ;;  %vm983_vm7 = vcmp.eq.f32.partialorder %v3453_v55, 0.0 }
 0x18e   : > { %v3757_v29 = vmul.f32 %v3736_v37, %v3656_v15  ;;  %v3759_v0 = vmax.f32 %v1653_v45, 1e-12  ;;  %v1489_v9 = vsub.f32 1.5, %v1488_v31  ;;  %v980_v5 = vmul.f32 %v979_v3, %v3453_v55 }
 0x18f   : > { %v3751_v12 = vsub.f32 %v4707_v53, %v4658_v57  ;;  %2470 = vrcp.f32 %v3739_v50  ;;  %v1233_v2 = vadd.f32 %v1217_v49, %v3273_v39  ;;  %v1452_v59 = vmul.f32 0.5, %v1451_v20 }
 0x190   : > { %v1522_v26 = vmul.f32 %v3725_v24, %v3613_v8  ;;  %v3768_v21 = vadd.f32 %v1331_v27, %v1234_v7  ;;  %2472 = vrcp.f32 %v3759_v0  ;;  %v1490_v22 = vmul.f32 %v2461_v36, %v1489_v9 }
 0x191   : > { %4708 = vst [vmem:[#allocation25_spill] sm:$0xff] %v3751_v12  ;;  %v3771_v63 = vadd.f32 %v1330_v52, %v1233_v2  ;;  %vm1492_vm8 = vcmp.eq.f32.partialorder %v3641_v23, inf  ;;  %v1453_v14 = vsub.f32 1.5, %v1452_v59  ;;  %v3777_v41 = vsub.f32 %v3660_v58, %v3162_v38 }
 0x192   : > { %vm1494_vm9 = vcmp.eq.f32.partialorder %v3641_v23, 0.0  ;;  %v3780_v3 = vpop.permute.xlu2 %1603  ;;  %v1523_v27 = vmul.f32 %v3725_v24, %v1522_v26  ;;  %v3783_v48 = vpop.eup %2468  ;;  %v982_v58 = vsel %vm981_vm6, %v3453_v55, %v980_v5  ;;  %v1491_v45 = vmul.f32 %v1490_v22, %v3641_v23 }
 0x193   : > { %2474 = vrsqrt.f32 %v3771_v63  ;;  %v3788_v7 = vpop.permute.xlu1 %1618  ;;  %v1495_v31 = vand.u32 2147483648, %v3641_v23  ;;  %v3796_v53 = vmul.f32 100.0, %v1963_v40  ;;  %v1454_v9 = vmul.f32 %v3713_v61, %v1453_v14 }
 0x194   : > { %2476 = vrsqrt.f32 %v3768_v21  ;;  %v1655_v20 = vadd.f32 %v3184_v19, %v3788_v7  ;;  %v1652_v2 = vadd.f32 %v3184_v19, %v3780_v3  ;;  %v1524_v59 = vmul.f32 0.5, %v1523_v27 }
 0x195   : > { %4709 = vst [vmem:[#allocation26_spill] sm:$0xff] %v3796_v53  ;;  %v3798_v49 = vpop.eup %2470  ;;  %v1493_v26 = vsel %vm1492_vm8, %v3641_v23, %v1491_v45  ;;  %vm1456_vm10 = vcmp.eq.f32.partialorder %v3652_v18, inf  ;;  %vm1458_vm11 = vcmp.eq.f32.partialorder %v3652_v18, 0.0  ;;  %v3816_v40 = vsel %vm983_vm7, %v984_v13, %v982_v58 }
 0x196   : > { %v3805_v5 = vpop.eup %2472  ;;  %v3822_v61 = vsel %vm1494_vm9, %v1495_v31, %v1493_v26  ;;  %v3824_v22 = vmax.f32 %v1655_v20, 1e-12  ;;  %v1459_v14 = vand.u32 2147483648, %v3652_v18  ;;  %v3830_v27 = vmul.f32 %v3798_v49, %v3739_v50 }
 0x197   : > { %v1803_v19 = vmul.f32 %v3805_v5, %v3759_v0  ;;  %2010 = vmax.xlane.f32.xlu1 %v3796_v53  ;;  %v4659_v55 = vsub.f32 0.0, %v3822_v61  ;;  %v1455_v13 = vmul.f32 %v1454_v9, %v3652_v18  ;;  %v3834_v58 = vmax.f32 %v1652_v2, 1e-12 }
 0x198   : > { %2478 = vrcp.f32 %v3824_v22  ;;  %v1525_v20 = vsub.f32 1.5, %v1524_v59  ;;  %v1813_v46 = vand.u32 2147483648, %v3759_v0  ;;  %vm1807_vm12 = vweird.f32 %v3759_v0 }
 0x199   : > { %v2475_v45 = vpop.eup %2474  ;;  %v1804_v23 = vsub.f32 1.0, %v1803_v19  ;;  %v3846_v9 = vsub.f32 %v1009_v1, %v4659_v55  ;;  %v1457_v2 = vsel %vm1456_vm10, %v3652_v18, %v1455_v13  ;;  %v1811_v59 = vand.u32 2147483647, %v3759_v0 }
 0x19a   : > { %v3838_v26 = vpop.eup %2476  ;;  %v1462_v57 = vmul.f32 %v2475_v45, %v3771_v63  ;;  %v3855_v19 = vsel %vm1458_vm11, %v1459_v14, %v1457_v2  ;;  %2480 = vrcp.f32 %v3834_v58  ;;  %v1839_v1 = vand.u32 2147483647, %v3824_v22 }
 0x19b   : > { %v3858_v11 = vpop.permute.xlu1 %1613  ;;  %v3860_v39 = vpop.permute.xlu2 %1261  ;;  %v4661_v36 = vsub.f32 0.0, %v3855_v19  ;;  %vm1528_vm13 = vcmp.eq.f32.partialorder %v3613_v8, inf  ;;  %vm1468_vm14 = vcmp.eq.f32.partialorder %v3771_v63, inf  ;;  %v1471_v13 = vand.u32 2147483648, %v3771_v63 }
 0x19c   : > { %4710 = vst [vmem:[#allocation27_spill] sm:$0xff] %v3860_v39  ;;  %v1463_v32 = vmul.f32 %v2475_v45, %v1462_v57  ;;  %v1805_v18 = vmul.f32 %v3805_v5, %v1804_v23  ;;  %v1841_v14 = vand.u32 2147483648, %v3824_v22  ;;  %v1526_v2 = vmul.f32 %v3725_v24, %v1525_v20 }
 0x19d   : > { %vm1470_vm15 = vcmp.eq.f32.partialorder %v3771_v63, 0.0  ;;  %v1814_v57 = vor.u32 1.1754944e-38, %v1813_v46  ;;  %v3875_v52 = vsub.f32 %v1006_v44, %v4661_v36  ;;  %v1474_v31 = vmul.f32 %v3838_v26, %v3768_v21 }
 0x19e   : > { %v1464_v55 = vmul.f32 0.5, %v1463_v32  ;;  %v2479_v53 = vpop.eup %2478  ;;  %vm1808_vm0 = vweird.f32 %v3805_v5  ;;  %v1527_v23 = vmul.f32 %v1526_v2, %v3613_v8  ;;  %vm1530_vm1 = vcmp.eq.f32.partialorder %v3613_v8, 0.0 }
 0x19f   : > { %v1531_v24 = vand.u32 2147483648, %v3613_v8  ;;  %vm3883_vm2 = vcmp.eq.f32.partialorder %v1811_v59, 8.507059e+37  ;;  %v1831_v28 = vmul.f32 %v2479_v53, %v3824_v22  ;;  %vm1835_vm3 = vweird.f32 %v3824_v22  ;;  %vm3916_vm7 = vmor %vm1807_vm12, %vm1808_vm0 }
 0x1a0   : > { %v1465_v20 = vsub.f32 1.5, %v1464_v55  ;;  %vm3889_vm4 = vcmp.eq.f32.partialorder %v1839_v1, 8.507059e+37  ;;  %v3893_v32 = vpop.eup %2480  ;;  %v1806_v2 = vadd.f32 %v3805_v5, %v1805_v18  ;;  %v1842_v36 = vor.u32 1.1754944e-38, %v1841_v14 }
 0x1a1   : > { %v1529_v55 = vsel %vm1528_vm13, %v3613_v8, %v1527_v23  ;;  %v1475_v59 = vmul.f32 %v3838_v26, %v1474_v31  ;;  %v1832_v6 = vsub.f32 1.0, %v1831_v28  ;;  %v1789_v12 = vmul.f32 %v3893_v32, %v3834_v58 }
 0x1a2   : > { %v1466_v47 = vmul.f32 %v2475_v45, %v1465_v20  ;;  %vm1793_vm5 = vweird.f32 %v3834_v58  ;;  %v1797_v1 = vand.u32 2147483647, %v3834_v58  ;;  %vm1836_vm6 = vweird.f32 %v2479_v53 }
 0x1a3   : > { %v1532_v18 = vsel %vm1530_vm1, %v1531_v24, %v1529_v55  ;;  %v1476_v14 = vmul.f32 0.5, %v1475_v59  ;;  %v1654_v23 = vadd.f32 %v3907_v10, %v3858_v11  ;;  %v1833_v20 = vmul.f32 %v2479_v53, %v1832_v6  ;;  %vm1837_vm8 = vmor %vm1835_vm3, %vm1836_vm6 }
 0x1a4   : > { %v1467_v45 = vmul.f32 %v1466_v47, %v3771_v63  ;;  %v1790_v28 = vsub.f32 1.0, %v1789_v12  ;;  %v1559_v8 = vsub.f32 0.0, %v1532_v18  ;;  %v3920_v24 = vpop.permute.xlu1 %1269  ;;  %v3922_v55 = vpop.permute.xlu2 %1593  ;;  %v1810_v59 = vsel %vm3916_vm7, %v3805_v5, %v1806_v2 }
 0x1a5   : > { %v1799_v47 = vand.u32 2147483648, %v3834_v58  ;;  %v1477_v56 = vsub.f32 1.5, %v1476_v14  ;;  %v3928_v30 = vmax.f32 %v1654_v23, 1e-12  ;;  %v1834_v6 = vadd.f32 %v2479_v53, %v1833_v20 }
 0x1a6   : > { %v1469_v0 = vsel %vm1468_vm14, %v3771_v63, %v1467_v45  ;;  %v1791_v12 = vmul.f32 %v3893_v32, %v1790_v28  ;;  %v4717_v18 = vsub.f32 0.0, %v3816_v40  ;;  %vm1794_vm9 = vweird.f32 %v3893_v32 }
 0x1a7   : > { %v1472_v39 = vsel %vm1470_vm15, %v1471_v13, %v1469_v0  ;;  %v1478_v5 = vmul.f32 %v3838_v26, %v1477_v56  ;;  %2482 = vrcp.f32 %v3928_v30  ;;  %v1838_v14 = vsel %vm1837_vm8, %v2479_v53, %v1834_v6  ;;  %vm3966_vm11 = vmor %vm1793_vm5, %vm1794_vm9 }
 0x1a8   : > { %v1930_v38 = vsub.f32 %v4717_v18, %v1559_v8  ;;  %v1554_v2 = vsub.f32 0.0, %v1472_v39  ;;  %v1792_v23 = vadd.f32 %v3893_v32, %v1791_v12  ;;  %v1815_v63 = vsel %vm3883_vm2, %v1814_v57, %v1810_v59 }
 0x1a9   : > { %v1843_v13 = vsel %vm3889_vm4, %v1842_v36, %v1838_v14  ;;  %v1479_v22 = vmul.f32 %v1478_v5, %v3768_v21  ;;  %v1498_v45 = vmul.f32 %v3783_v48, %v3716_v54  ;;  %v4718_v56 = vsub.f32 0.0, %v3421_v62 }
 0x1aa   : > { %v1946_v40 = vmul.f32 %v1930_v38, %v3728_v43  ;;  %v1911_v39 = vmul.f32 %v1843_v13, %v3788_v7  ;;  %vm1480_vm10 = vcmp.eq.f32.partialorder %v3768_v21, inf  ;;  %v1706_v38 = vsub.f32 1.0, %v3830_v27 }
 0x1ab   : > { %v1925_v26 = vsub.f32 %v4718_v56, %v1554_v2  ;;  %v3960_v43 = vmul.f32 %v3777_v41, %v3777_v41  ;;  %v1481_v62 = vsel %vm1480_vm10, %v3768_v21, %v1479_v22  ;;  %v1483_v7 = vand.u32 2147483648, %v3768_v21 }
 0x1ac   : > { %v1962_v53 = vadd.f32 %v1946_v40, %v1559_v8  ;;  %vm1709_vm12 = vweird.f32 %v3739_v50  ;;  %v1909_v27 = vmul.f32 %v1815_v63, %v3732_v51  ;;  %v1796_v41 = vsel %vm3966_vm11, %v3893_v32, %v1792_v23  ;;  %v3980_v58 = vpop.permute.xlu1 %1265  ;;  %v3982_v46 = vpop.permute.xlu2 %1588 }
 0x1ad   : > { %vm1482_vm13 = vcmp.eq.f32.partialorder %v3768_v21, 0.0  ;;  %v2483_v44 = vpop.eup %2482  ;;  %v1943_v31 = vmul.f32 %v3846_v9, %v1911_v39  ;;  %v1800_v20 = vor.u32 1.1754944e-38, %v1799_v47  ;;  %v1499_v51 = vmul.f32 %v3783_v48, %v1498_v45 }
 0x1ae   : > { %v3977_v57 = vmul.f32 100.0, %v1962_v53  ;;  %v3985_v28 = vsel %vm1482_vm13, %v1483_v7, %v1481_v62  ;;  %v1941_v8 = vmul.f32 %v1925_v26, %v1909_v27  ;;  %vm1798_vm14 = vcmp.eq.f32.partialorder %v1797_v1, 8.507059e+37  ;;  %v4739_v7 = vld [vmem:[#allocation10_spill] sm:$0xff] }
 0x1af   : > { %v1555_v32 = vsub.f32 0.0, %v3985_v28  ;;  %v1817_v21 = vmul.f32 %v2483_v44, %v3928_v30  ;;  %v4721_v59 = vsub.f32 1.0, %v3757_v29  ;;  %vm1779_vm15 = vweird.f32 %v3656_v15 }
 0x1b0   : > { %2008 = vmax.xlane.f32.xlu2 %v3977_v57  ;;  %vm1780_vm0 = vweird.f32 %v3736_v37  ;;  %vm1710_vm1 = vweird.f32 %v3798_v49  ;;  %v1801_v9 = vsel %vm1798_vm14, %v1800_v20, %v1796_v41  ;;  %v1500_v47 = vmul.f32 0.5, %v1499_v51 }
 0x1b1   : > { %v1777_v0 = vmul.f32 %v3736_v37, %v4721_v59  ;;  %v1707_v1 = vmul.f32 %v3798_v49, %v1706_v38  ;;  %v1818_v6 = vsub.f32 1.0, %v1817_v21  ;;  %v4722_v12 = vsub.f32 0.0, %v3491_v17  ;;  %vm4030_vm8 = vmor %vm1709_vm12, %vm1710_vm1 }
 0x1b2   : > { %v1650_v29 = vadd.f32 %v3907_v10, %v3922_v55  ;;  %v1825_v5 = vand.u32 2147483647, %v3928_v30  ;;  %v1827_v14 = vand.u32 2147483648, %v3928_v30  ;;  %v1501_v23 = vsub.f32 1.5, %v1500_v47  ;;  %vm4050_vm9 = vmor %vm1779_vm15, %vm1780_vm0 }
 0x1b3   : > { %v1926_v18 = vsub.f32 %v4722_v12, %v1555_v32  ;;  %v4723_v40 = vsub.f32 0.0, %v3822_v61  ;;  %v1908_v13 = vmul.f32 %v1801_v9, %v3780_v3  ;;  %v1819_v22 = vmul.f32 %v2483_v44, %v1818_v6  ;;  %v4747_v12 = vld [vmem:[#allocation11_spill] sm:$0xff] }
 0x1b4   : > { %vm1822_vm2 = vweird.f32 %v2483_v44  ;;  %v1957_v45 = vadd.f32 %v1941_v8, %v1554_v2  ;;  %v1502_v56 = vmul.f32 %v3783_v48, %v1501_v23  ;;  %v1312_v17 = vsub.f32 %v3920_v24, %v3271_v35 }
 0x1b5   : > { %v1959_v63 = vadd.f32 %v1943_v31, %v4723_v40  ;;  %v4012_v26 = vmax.f32 %v1650_v29, 1e-12  ;;  %v1708_v53 = vadd.f32 %v3798_v49, %v1707_v1  ;;  %v1820_v38 = vadd.f32 %v2483_v44, %v1819_v22  ;;  %v1149_v24 = vpop.permute.xlu1 %1148  ;;  %v1246_v2 = vpop.permute.xlu2 %1245  ;;  %v4736_v22 = vld [vmem:[#allocation8_spill] sm:$0xff] }
 0x1b6   : > { %vm1821_vm3 = vweird.f32 %v3928_v30  ;;  %v1649_v3 = vadd.f32 %v3907_v10, %v3982_v46  ;;  %vm1826_vm5 = vcmp.eq.f32.partialorder %v1825_v5, 8.507059e+37  ;;  %v1828_v61 = vor.u32 1.1754944e-38, %v1827_v14 }
 0x1b7   : > { %v4014_v39 = vmul.f32 100.0, %v1959_v63  ;;  %vm1823_vm4 = vmor %vm1821_vm3, %vm1822_vm2  ;;  %v1503_v48 = vmul.f32 %v1502_v56, %v3716_v54  ;;  %vm1504_vm6 = vcmp.eq.f32.partialorder %v3716_v54, inf  ;;  %v1940_v36 = vmul.f32 %v3875_v52, %v1908_v13 }
 0x1b8   : > { %v1824_v62 = vsel %vm1823_vm4, %v2483_v44, %v1820_v38  ;;  %vm1506_vm7 = vcmp.eq.f32.partialorder %v3716_v54, 0.0  ;;  %v1507_v30 = vand.u32 2147483648, %v3716_v54  ;;  %v1328_v31 = vmul.f32 %v1312_v17, %v1312_v17  ;;  %v4737_v38 = vld [vmem:[#allocation27_spill] sm:$0xff] }
 0x1b9   : > { %2002 = vmax.xlane.f32.xlu1 %v4014_v39  ;;  %v1829_v27 = vsel %vm1826_vm5, %v1828_v61, %v1824_v62  ;;  %v1505_v41 = vsel %vm1504_vm6, %v3716_v54, %v1503_v48  ;;  %2484 = vrcp.f32 %v4012_v26  ;;  %v4726_v52 = vand.u32 2147483648, %v3739_v50 }
 0x1ba   : > { %v1910_v20 = vmul.f32 %v1829_v27, %v3858_v11  ;;  %v1508_v51 = vsel %vm1506_vm7, %v1507_v30, %v1505_v41  ;;  %v4039_v8 = vmax.f32 %v1649_v3, 1e-12  ;;  %v1778_v21 = vadd.f32 %v3736_v37, %v1777_v0  ;;  %v4738_v30 = vld [vmem:[#allocation15_spill] sm:$0xff] }
 0x1bb   : > { %v1716_v44 = vor.u32 1.1754944e-38, %v4726_v52  ;;  %v1231_v59 = vadd.f32 %v3960_v43, %v3500_v4  ;;  %v1557_v9 = vsub.f32 0.0, %v1508_v51  ;;  %v4044_v47 = vmul.f32 100.0, %v1957_v45 }
 0x1bc   : > { %v1712_v11 = vsel %vm4030_vm8, %v3798_v49, %v1708_v53  ;;  %v4729_v0 = vand.u32 2147483647, %v3739_v50  ;;  %v1942_v1 = vmul.f32 %v1926_v18, %v1910_v20  ;;  %v4730_v4 = vsub.f32 0.0, %v3855_v19  ;;  %v4742_v20 = vld [vmem:[#allocation13_spill] sm:$0xff] }
 0x1bd   : > { %v4731_v6 = vand.u32 2147483647, %v3656_v15  ;;  %v4734_v29 = vsub.f32 0.0, %v3496_v60  ;;  %v4069_v14 = vadd.f32 %v1328_v31, %v1231_v59  ;;  %1998 = vmax.xlane.f32.xlu0 %v4044_v47  ;;  %v810_v50 = vsub.f32 1.5, %v3687_v42  ;;  %v1242_v42 = vpop.permute.xlu2 %1241  ;;  %v4741_v31 = vld [vmem:[#allocation22_spill] sm:$0xff]  ;;  %v4744_v59 = vld [vmem:[#allocation21_spill] sm:$0xff] }
 0x1be   : > { %vm1714_vm10 = vcmp.eq.f32.partialorder %v4729_v0, 8.507059e+37  ;;  %v1956_v43 = vadd.f32 %v1940_v36, %v4730_v4  ;;  %v4735_v49 = vand.u32 2147483648, %v3656_v15  ;;  %2486 = vrcp.f32 %v4039_v8 }
 0x1bf   : > { %vm4063_vm11 = vcmp.eq.f32.partialorder %v4731_v6, 8.507059e+37  ;;  %v1928_v5 = vsub.f32 %v4734_v29, %v1557_v9  ;;  %v1958_v19 = vadd.f32 %v1942_v1, %v1555_v32  ;;  %v4080_v40 = vpop.eup %2484  ;;  %v1782_v60 = vsel %vm4050_vm9, %v3736_v37, %v1778_v21  ;;  %v1258_v32 = vpop.permute.xlu1 %1257  ;;  %v4743_v21 = vld [vmem:[#allocation9_spill] sm:$0xff]  ;;  %v4746_v1 = vld [vmem:[#allocation14_spill] sm:$0xff] }
 0x1c0   : > { %v1786_v18 = vor.u32 1.1754944e-38, %v4735_v49  ;;  %v4078_v23 = vmul.f32 100.0, %v1956_v43  ;;  %v1717_v63 = vsel %vm1714_vm10, %v1716_v44, %v1712_v11  ;;  %v1311_v15 = vsub.f32 %v3980_v58, %v3271_v35  ;;  %v4745_v11 = vld [vmem:[#allocation25_spill] sm:$0xff] }
 0x1c1   : > { %v1944_v13 = vmul.f32 %v1928_v5, %v3353_v16  ;;  %2488 = vrsqrt.f32 %v4736_v22  ;;  %v1116_v28 = vmul.f32 %v3376_v25, %v3376_v25  ;;  %v1305_v45 = vsub.f32 %v1242_v42, %v3271_v35 }
 0x1c2   : > { %1996 = vmax.xlane.f32.xlu1 %v4078_v23  ;;  %2490 = vrsqrt.f32 %v4069_v14  ;;  %v1309_v37 = vsub.f32 %v1258_v32, %v3271_v35  ;;  %v811_v16 = vmul.f32 %v3460_v33, %v810_v50  ;;  %v1787_v58 = vsel %vm4063_vm11, %v1786_v18, %v1782_v60 }
 0x1c3   : > { %v1960_v56 = vadd.f32 %v1944_v13, %v1557_v9  ;;  %v1902_v17 = vmul.f32 %v1717_v63, %v3691_v34  ;;  %v1761_v25 = vmul.f32 %v4080_v40, %v4012_v26  ;;  %v1321_v53 = vmul.f32 %v1305_v45, %v1305_v45  ;;  %v4740_v34 = vld [vmem:[#allocation17_spill] sm:$0xff] }
 0x1c4   : > { %v1310_v3 = vsub.f32 %v4737_v38, %v3271_v35  ;;  %v1327_v48 = vmul.f32 %v1311_v15, %v1311_v15  ;;  %v1325_v36 = vmul.f32 %v1309_v37, %v1309_v37  ;;  %v4105_v62 = vpop.eup %2486  ;;  %2492 = vrsqrt.f32 %v4738_v30  ;;  %v4748_v38 = vld [vmem:[#allocation5_spill] sm:$0xff] }
 0x1c5   : > { %v4103_v61 = vmul.f32 100.0, %v1960_v56  ;;  %v1771_v33 = vand.u32 2147483648, %v4012_v26  ;;  %v1197_v27 = vsub.f32 %v1149_v24, %v4739_v7  ;;  %v4111_v41 = vadd.f32 %v1321_v53, %v4740_v34 }
 0x1c6   : > { %v4114_v52 = vmul.f32 %v1787_v58, %v4741_v31  ;;  %v1306_v44 = vsub.f32 %v1246_v2, %v3271_v35  ;;  %v4119_v51 = vadd.f32 %v1325_v36, %v4742_v20  ;;  %v891_v9 = vmul.f32 %v4744_v59, %v4743_v21  ;;  %v4162_v7 = vpop.permute.xlu2 %1563 }
 0x1c7   : > { %2004 = vmax.xlane.f32.xlu2 %v4103_v61  ;;  %v4123_v54 = vpop.eup %2488  ;;  %v4126_v24 = vmul.f32 %v4745_v11, %v1902_v17  ;;  %v1762_v0 = vsub.f32 1.0, %v1761_v25  ;;  %2494 = vrsqrt.f32 %v4111_v41  ;;  %v812_v4 = vmul.f32 %v811_v16, %v4746_v1  ;;  %v1254_v15 = vpop.permute.xlu1 %1253 }
 0x1c8   : > { %v2491_v43 = vpop.eup %2490  ;;  %v4130_v6 = vmul.f32 %v1310_v3, %v1310_v3  ;;  %v1769_v2 = vand.u32 2147483647, %v4012_v26  ;;  %v4134_v29 = vadd.f32 %v1327_v48, %v4747_v12  ;;  %v1747_v5 = vmul.f32 %v4105_v62, %v4039_v8  ;;  %v4749_v3 = vld [vmem:[#allocation16_spill] sm:$0xff] }
 0x1c9   : > { %v4138_v50 = vor.u32 1.1754944e-38, %v1771_v33  ;;  %v1757_v49 = vand.u32 2147483648, %v4039_v8  ;;  %v1213_v18 = vmul.f32 %v1197_v27, %v1197_v27  ;;  %v892_v60 = vmul.f32 %v4744_v59, %v891_v9 }
 0x1ca   : > { %v1322_v63 = vmul.f32 %v1306_v44, %v1306_v44  ;;  %v4142_v13 = vmul.f32 100.0, %v1958_v19  ;;  %2496 = vrsqrt.f32 %v4119_v51  ;;  %vm813_vm12 = vcmp.eq.f32.partialorder %v4746_v1, inf  ;;  %v4146_v42 = vpop.eup %2492  ;;  %v4750_v44 = vld [vmem:[#allocation12_spill] sm:$0xff] }
 0x1cb   : > { %v1763_v32 = vmul.f32 %v4080_v40, %v1762_v0  ;;  %v814_v45 = vsel %vm813_vm12, %v4746_v1, %v812_v4  ;;  %v893_v56 = vmul.f32 0.5, %v892_v60  ;;  %v1438_v37 = vmul.f32 %v2491_v43, %v4069_v14 }
 0x1cc   : > { %2498 = vrsqrt.f32 %v4134_v29  ;;  %v1748_v16 = vsub.f32 1.0, %v1747_v5  ;;  %v1755_v19 = vand.u32 2147483647, %v4039_v8  ;;  %v816_v58 = vand.u32 2147483648, %v4746_v1 }
 0x1cd   : > { %v2495_v17 = vpop.eup %2494  ;;  %vm815_vm13 = vcmp.eq.f32.partialorder %v4746_v1, 0.0  ;;  %v894_v25 = vsub.f32 1.5, %v893_v56  ;;  %v1439_v53 = vmul.f32 %v2491_v43, %v1438_v37  ;;  %v855_v48 = vmul.f32 %v4749_v3, %v4748_v38 }
 0x1ce   : > { %v4157_v36 = vor.u32 1.1754944e-38, %v1757_v49  ;;  %v4159_v33 = vadd.f32 %v1213_v18, %v1116_v28  ;;  %v4164_v27 = vsel %vm815_vm13, %v816_v58, %v814_v45  ;;  %v1354_v34 = vmul.f32 %v2495_v17, %v4111_v41 }
 0x1cf   : > { %2000 = vmax.xlane.f32.xlu2 %v4142_v13  ;;  %v4168_v31 = vadd.f32 %v4080_v40, %v1763_v32  ;;  %v4171_v20 = vadd.f32 %v1322_v63, %v4750_v44  ;;  %v895_v9 = vmul.f32 %v4744_v59, %v894_v25  ;;  %v1440_v11 = vmul.f32 0.5, %v1439_v53  ;;  %v4194_v53 = vpop.permute.xlu1 %1583 }
 0x1d0   : > { %v2497_v0 = vpop.eup %2496  ;;  %v4175_v28 = vmul.f32 %v4105_v62, %v1748_v16  ;;  %v1308_v1 = vsub.f32 %v1254_v15, %v3271_v35  ;;  %v1355_v4 = vmul.f32 %v2495_v17, %v1354_v34  ;;  %v856_v12 = vmul.f32 %v4749_v3, %v855_v48 }
 0x1d1   : > { %vm1766_vm14 = vweird.f32 %v4080_v40  ;;  %v998_v5 = vsub.f32 0.0, %v4164_v27  ;;  %vm1360_vm15 = vcmp.eq.f32.partialorder %v4111_v41, inf  ;;  %v1644_v49 = vadd.f32 %v3907_v10, %v4162_v7 }
 0x1d2   : > { %v896_v59 = vmul.f32 %v895_v9, %v4743_v21  ;;  %v1441_v18 = vsub.f32 1.5, %v1440_v11  ;;  %v4185_v60 = vpop.eup %2498  ;;  %v1356_v63 = vmul.f32 0.5, %v1355_v4  ;;  %v1363_v35 = vand.u32 2147483648, %v4111_v41 }
 0x1d3   : > { %vm897_vm0 = vcmp.eq.f32.partialorder %v4743_v21, inf  ;;  %v857_v15 = vmul.f32 0.5, %v856_v12  ;;  %vm1765_vm1 = vweird.f32 %v4012_v26  ;;  %vm899_vm2 = vcmp.eq.f32.partialorder %v4743_v21, 0.0 }
 0x1d4   : > { %v898_v32 = vsel %vm897_vm0, %v4743_v21, %v896_v59  ;;  %v1442_v45 = vmul.f32 %v2491_v43, %v1441_v18  ;;  %v1402_v56 = vmul.f32 %v2497_v0, %v4119_v51  ;;  %v1324_v37 = vmul.f32 %v1308_v1, %v1308_v1  ;;  %vm4236_vm10 = vmor %vm1765_vm1, %vm1766_vm14 }
 0x1d5   : > { %v1357_v16 = vsub.f32 1.5, %v1356_v63  ;;  %v900_v58 = vand.u32 2147483648, %v4743_v21  ;;  %v858_v25 = vsub.f32 1.5, %v857_v15  ;;  %v4196_v48 = vmax.f32 %v1644_v49, 1e-12 }
 0x1d6   : > { %v1443_v27 = vmul.f32 %v1442_v45, %v4069_v14  ;;  %vm1444_vm3 = vcmp.eq.f32.partialorder %v4069_v14, inf  ;;  %v1447_v34 = vand.u32 2147483648, %v4069_v14  ;;  %v1403_v11 = vmul.f32 %v2497_v0, %v1402_v56 }
 0x1d7   : > { %v1358_v44 = vmul.f32 %v2495_v17, %v1357_v16  ;;  %v901_v9 = vsel %vm899_vm2, %v900_v58, %v898_v32  ;;  %v859_v43 = vmul.f32 %v4749_v3, %v858_v25  ;;  %vm1446_vm4 = vcmp.eq.f32.partialorder %v4069_v14, 0.0 }
 0x1d8   : > { %v1445_v1 = vsel %vm1444_vm3, %v4069_v14, %v1443_v27  ;;  %v1648_v21 = vadd.f32 %v3907_v10, %v4194_v53  ;;  %v879_v4 = vmul.f32 %v4123_v54, %v4736_v22  ;;  %vm1752_vm5 = vweird.f32 %v4105_v62  ;;  %v4753_v14 = vld [vmem:[#allocation20_spill] sm:$0xff] }
 0x1d9   : > { %v1359_v12 = vmul.f32 %v1358_v44, %v4111_v41  ;;  %v1448_v49 = vsel %vm1446_vm4, %v1447_v34, %v1445_v1  ;;  %v860_v17 = vmul.f32 %v859_v43, %v4748_v38  ;;  %v1404_v59 = vmul.f32 0.5, %v1403_v11 }
 0x1da   : > { %vm4213_vm6 = vcmp.eq.f32.partialorder %v1769_v2, 8.507059e+37  ;;  %v4218_v18 = vadd.f32 %v1324_v37, %v4753_v14  ;;  %v1005_v63 = vsub.f32 0.0, %v901_v9  ;;  %v1552_v15 = vsub.f32 0.0, %v1448_v49 }
 0x1db   : > { %v4220_v32 = vmax.f32 %v1648_v21, 1e-12  ;;  %vm1751_vm7 = vweird.f32 %v4039_v8  ;;  %v1361_v45 = vsel %vm1360_vm15, %v4111_v41, %v1359_v12  ;;  %vm1362_vm8 = vcmp.eq.f32.partialorder %v4111_v41, 0.0 }
 0x1dc   : > { %2500 = vrcp.f32 %v4196_v48  ;;  %v1405_v2 = vsub.f32 1.5, %v1404_v59  ;;  %v4228_v56 = vsel %vm1362_vm8, %v1363_v35, %v1361_v45  ;;  %v1923_v16 = vsub.f32 %v1005_v63, %v1552_v15  ;;  %vm4289_vm14 = vmor %vm1751_vm7, %vm1752_vm5 }
 0x1dd   : > { %vm861_vm9 = vcmp.eq.f32.partialorder %v4748_v38, inf  ;;  %v880_v37 = vmul.f32 %v4123_v54, %v879_v4  ;;  %v1545_v41 = vsub.f32 0.0, %v4228_v56  ;;  %2502 = vrcp.f32 %v4220_v32 }
 0x1de   : > { %v862_v25 = vsel %vm861_vm9, %v4748_v38, %v860_v17  ;;  %v1406_v27 = vmul.f32 %v2497_v0, %v1405_v2  ;;  %v1768_v35 = vsel %vm4236_vm10, %v4080_v40, %v4168_v31  ;;  %2504 = vrsqrt.f32 %v4218_v18  ;;  %v4758_v2 = vld [vmem:[#allocation7_spill] sm:$0xff] }
 0x1df   : > { %v1939_v26 = vmul.f32 %v1923_v16, %v4114_v52  ;;  %v864_v34 = vand.u32 2147483648, %v4748_v38  ;;  %v4252_v44 = vsub.f32 %v998_v5, %v1545_v41  ;;  %vm863_vm11 = vcmp.eq.f32.partialorder %v4748_v38, 0.0  ;;  %v4759_v16 = vld [vmem:[#allocation19_spill] sm:$0xff] }
 0x1e0   : > { %v1407_v0 = vmul.f32 %v1406_v27, %v4119_v51  ;;  %vm1408_vm12 = vcmp.eq.f32.partialorder %v4119_v51, inf  ;;  %v1411_v40 = vand.u32 2147483648, %v4119_v51  ;;  %v881_v31 = vmul.f32 0.5, %v880_v37 }
 0x1e1   : > { %v1955_v9 = vadd.f32 %v1939_v26, %v1552_v15  ;;  %v865_v43 = vsel %vm863_vm11, %v864_v34, %v862_v25  ;;  %v4262_v52 = vadd.f32 %v4105_v62, %v4175_v28  ;;  %v4266_v5 = vadd.f32 %v4130_v6, %v4159_v33  ;;  %v4319_v34 = vpop.permute.xlu1 %1578 }
 0x1e2   : > { %v4258_v11 = vpop.eup %2500  ;;  %v1409_v38 = vsel %vm1408_vm12, %v4119_v51, %v1407_v0  ;;  %vm1410_vm13 = vcmp.eq.f32.partialorder %v4119_v51, 0.0  ;;  %2506 = vrsqrt.f32 %v4171_v20  ;;  %v882_v4 = vsub.f32 1.5, %v881_v31 }
 0x1e3   : > { %v4271_v1 = vmul.f32 100.0, %v1955_v9  ;;  %v4273_v21 = vsel %vm1410_vm13, %v1411_v40, %v1409_v38  ;;  %v4275_v12 = vpop.eup %2502  ;;  %v4280_v28 = vsel %vm4213_vm6, %v4138_v50, %v1768_v35  ;;  %v1002_v6 = vsub.f32 0.0, %v865_v43 }
 0x1e4   : > { %v1549_v33 = vsub.f32 0.0, %v4273_v21  ;;  %v1426_v51 = vmul.f32 %v4185_v60, %v4134_v29  ;;  %v2505_v49 = vpop.eup %2504  ;;  %v1733_v50 = vmul.f32 %v4275_v12, %v4220_v32  ;;  %v1741_v59 = vand.u32 2147483647, %v4220_v32 }
 0x1e5   : > { %1994 = vmax.xlane.f32.xlu2 %v4271_v1  ;;  %v1743_v3 = vand.u32 2147483648, %v4220_v32  ;;  %v883_v14 = vmul.f32 %v4123_v54, %v882_v4  ;;  %v1754_v63 = vsel %vm4289_vm14, %v4105_v62, %v4262_v52  ;;  %v843_v37 = vmul.f32 %v4759_v16, %v4758_v2 }
 0x1e6   : > { %v4305_v15 = vsub.f32 %v1002_v6, %v1549_v33  ;;  %v1427_v45 = vmul.f32 %v4185_v60, %v1426_v51  ;;  %v4312_v58 = vmul.f32 %v4258_v11, %v4196_v48  ;;  %v1734_v25 = vsub.f32 1.0, %v1733_v50 }
 0x1e7   : > { %v884_v54 = vmul.f32 %v883_v14, %v4736_v22  ;;  %vm885_vm15 = vcmp.eq.f32.partialorder %v4736_v22, inf  ;;  %vm1737_vm0 = vweird.f32 %v4220_v32  ;;  %v844_v35 = vmul.f32 %v4759_v16, %v843_v37 }
 0x1e8   : > { %v1428_v27 = vmul.f32 0.5, %v1427_v45  ;;  %v1390_v26 = vmul.f32 %v2505_v49, %v4218_v18  ;;  %v4321_v0 = vpop.eup %2506  ;;  %v1735_v9 = vmul.f32 %v4275_v12, %v1734_v25  ;;  %vm4324_vm1 = vcmp.eq.f32.partialorder %v1741_v59, 8.507059e+37 }
 0x1e9   : > { %v1744_v40 = vor.u32 1.1754944e-38, %v1743_v3  ;;  %vm887_vm2 = vcmp.eq.f32.partialorder %v4736_v22, 0.0  ;;  %vm1738_vm3 = vweird.f32 %v4275_v12  ;;  %v845_v38 = vmul.f32 0.5, %v844_v35  ;;  %v4766_v3 = vld [vmem:[#allocation6_spill] sm:$0xff] }
 0x1ea   : > { %v1429_v31 = vsub.f32 1.5, %v1428_v27  ;;  %v1391_v4 = vmul.f32 %v2505_v49, %v1390_v26  ;;  %v1736_v6 = vadd.f32 %v4275_v12, %v1735_v9  ;;  %v886_v51 = vsel %vm885_vm15, %v4736_v22, %v884_v54  ;;  %vm4355_vm7 = vmor %vm1737_vm0, %vm1738_vm3 }
 0x1eb   : > { %v1647_v50 = vadd.f32 %v3907_v10, %v4319_v34  ;;  %v867_v59 = vmul.f32 %v4146_v42, %v4738_v30  ;;  %vm4340_vm4 = vcmp.eq.f32.partialorder %v1755_v19, 8.507059e+37  ;;  %v888_v14 = vand.u32 2147483648, %v4736_v22 }
 0x1ec   : > { %v1430_v45 = vmul.f32 %v4185_v60, %v1429_v31  ;;  %v846_v37 = vsub.f32 1.5, %v845_v38  ;;  %v1392_v25 = vmul.f32 0.5, %v1391_v4  ;;  %vm1432_vm5 = vcmp.eq.f32.partialorder %v4134_v29, inf }
 0x1ed   : > { %vm1434_vm6 = vcmp.eq.f32.partialorder %v4134_v29, 0.0  ;;  %v4348_v54 = vmax.f32 %v1647_v50, 1e-12  ;;  %v868_v27 = vmul.f32 %v4146_v42, %v867_v59  ;;  %v889_v19 = vsel %vm887_vm2, %v888_v14, %v886_v51 }
 0x1ee   : > { %v1431_v60 = vmul.f32 %v1430_v45, %v4134_v29  ;;  %v847_v35 = vmul.f32 %v4759_v16, %v846_v37  ;;  %v1393_v26 = vsub.f32 1.5, %v1392_v25  ;;  %v1740_v9 = vsel %vm4355_vm7, %v4275_v12, %v1736_v6 }
 0x1ef   : > { %v1435_v31 = vand.u32 2147483648, %v4134_v29  ;;  %vm849_vm8 = vcmp.eq.f32.partialorder %v4758_v2, inf  ;;  %2508 = vrcp.f32 %v4348_v54  ;;  %vm851_vm9 = vcmp.eq.f32.partialorder %v4758_v2, 0.0 }
 0x1f0   : > { %v1433_v32 = vsel %vm1432_vm5, %v4134_v29, %v1431_v60  ;;  %v848_v22 = vmul.f32 %v847_v35, %v4758_v2  ;;  %v1394_v38 = vmul.f32 %v2505_v49, %v1393_v26  ;;  %v1004_v4 = vsub.f32 0.0, %v889_v19 }
 0x1f1   : > { %v1436_v16 = vsel %vm1434_vm6, %v1435_v31, %v1433_v32  ;;  %v852_v51 = vand.u32 2147483648, %v4758_v2  ;;  %v869_v12 = vmul.f32 0.5, %v868_v27  ;;  %v1745_v6 = vsel %vm4324_vm1, %v1744_v40, %v1740_v9  ;;  %v4412_v32 = vpop.permute.xlu1 %1568 }
 0x1f2   : > { %v1551_v50 = vsub.f32 0.0, %v1436_v16  ;;  %v850_v59 = vsel %vm849_vm8, %v4758_v2, %v848_v22  ;;  %v1395_v14 = vmul.f32 %v1394_v38, %v4218_v18  ;;  %vm1396_vm10 = vcmp.eq.f32.partialorder %v4218_v18, inf }
 0x1f3   : > { %v853_v45 = vsel %vm851_vm9, %v852_v51, %v850_v59  ;;  %v1399_v49 = vand.u32 2147483648, %v4218_v18  ;;  %2510 = vrsqrt.f32 %v4266_v5  ;;  %v1906_v29 = vmul.f32 %v4280_v28, %v3922_v55 }
 0x1f4   : > { %v1922_v37 = vsub.f32 %v1004_v4, %v1551_v50  ;;  %v1397_v25 = vsel %vm1396_vm10, %v4218_v18, %v1395_v14  ;;  %vm1398_vm11 = vcmp.eq.f32.partialorder %v4218_v18, 0.0  ;;  %v4394_v2 = vsel %vm4340_vm4, %v4157_v36, %v1754_v63  ;;  %v4767_v36 = vld [vmem:[#allocation18_spill] sm:$0xff] }
 0x1f5   : > { %v2509_v43 = vpop.eup %2508  ;;  %v1904_v40 = vmul.f32 %v1745_v6, %v4194_v53  ;;  %v4397_v27 = vsel %vm1398_vm11, %v1399_v49, %v1397_v25  ;;  %v870_v55 = vsub.f32 1.5, %v869_v12  ;;  %v1001_v8 = vsub.f32 0.0, %v853_v45  ;;  %v4770_v25 = vld [vmem:[#allocation24_spill] sm:$0xff] }
 0x1f6   : > { %v1938_v28 = vmul.f32 %v1922_v37, %v1906_v29  ;;  %v1548_v18 = vsub.f32 0.0, %v4397_v27  ;;  %v1719_v19 = vmul.f32 %v2509_v43, %v4348_v54  ;;  %v1678_v17 = vsub.f32 1.0, %v4312_v58 }
 0x1f7   : > { %v1727_v62 = vand.u32 2147483647, %v4348_v54  ;;  %v1729_v52 = vand.u32 2147483648, %v4348_v54  ;;  %v819_v63 = vmul.f32 %v4767_v36, %v4766_v3  ;;  %vm1723_vm12 = vweird.f32 %v4348_v54 }
 0x1f8   : > { %v1954_v60 = vadd.f32 %v1938_v28, %v1551_v50  ;;  %v1919_v53 = vsub.f32 %v1001_v8, %v1548_v18  ;;  %v1720_v35 = vsub.f32 1.0, %v1719_v19  ;;  %v1936_v9 = vmul.f32 %v4305_v15, %v1904_v40  ;;  %v2007_v28 = vpop.xlane.xlu0 %2006 }
 0x1f9   : > { %v2511_v26 = vpop.eup %2510  ;;  %v871_v31 = vmul.f32 %v4146_v42, %v870_v55  ;;  %vm873_vm13 = vcmp.eq.f32.partialorder %v4738_v30, inf  ;;  %v820_v22 = vmul.f32 %v4767_v36, %v819_v63  ;;  %v1366_v38 = vmul.f32 %v4321_v0, %v4171_v20 }
 0x1fa   : > { %v4417_v4 = vmul.f32 100.0, %v1954_v60  ;;  %v1721_v16 = vmul.f32 %v2509_v43, %v1720_v35  ;;  %vm1724_vm14 = vweird.f32 %v2509_v43  ;;  %v1414_v51 = vmul.f32 %v2511_v26, %v4266_v5 }
 0x1fb   : > { %vm4420_vm15 = vcmp.eq.f32.partialorder %v1727_v62, 8.507059e+37  ;;  %v1730_v42 = vor.u32 1.1754944e-38, %v1729_v52  ;;  %v821_v15 = vmul.f32 0.5, %v820_v22  ;;  %v1367_v6 = vmul.f32 %v4321_v0, %v1366_v38  ;;  %vm1725_vm1 = vmor %vm1723_vm12, %vm1724_vm14 }
 0x1fc   : > { %1992 = vmax.xlane.f32.xlu0 %v4417_v4  ;;  %v1722_v50 = vadd.f32 %v2509_v43, %v1721_v16  ;;  %vm875_vm0 = vcmp.eq.f32.partialorder %v4738_v30, 0.0  ;;  %v876_v59 = vand.u32 2147483648, %v4738_v30  ;;  %v1415_v14 = vmul.f32 %v2511_v26, %v1414_v51 }
 0x1fd   : > { %v1645_v45 = vadd.f32 %v3907_v10, %v4412_v32  ;;  %vm1420_vm2 = vcmp.eq.f32.partialorder %v4266_v5, inf  ;;  %v822_v49 = vsub.f32 1.5, %v821_v15  ;;  %v1368_v29 = vmul.f32 0.5, %v1367_v6 }
 0x1fe   : > { %v1952_v37 = vadd.f32 %v1936_v9, %v1549_v33  ;;  %v4771_v40 = vsub.f32 0.0, %v4770_v25  ;;  %v1726_v8 = vsel %vm1725_vm1, %v2509_v43, %v1722_v50  ;;  %v872_v19 = vmul.f32 %v871_v31, %v4738_v30  ;;  %v4772_v43 = vld [vmem:[#allocation23_spill] sm:$0xff] }
 0x1ff   : > { %v1416_v62 = vmul.f32 0.5, %v1415_v14  ;;  %vm1422_vm3 = vcmp.eq.f32.partialorder %v4266_v5, 0.0  ;;  %v4440_v10 = vmax.f32 %v1645_v45, 1e-12  ;;  %v1731_v54 = vsel %vm4420_vm15, %v1730_v42, %v1726_v8 }
 0x200   : > { %v1950_v55 = vadd.f32 %v4126_v24, %v4771_v40  ;;  %v823_v52 = vmul.f32 %v4767_v36, %v822_v49  ;;  %v1369_v21 = vsub.f32 1.5, %v1368_v29  ;;  %v4445_v33 = vmul.f32 100.0, %v1952_v37 }
 0x201   : > { %v1903_v63 = vmul.f32 %v1731_v54, %v4319_v34  ;;  %v1417_v24 = vsub.f32 1.5, %v1416_v62  ;;  %2512 = vrcp.f32 %v4440_v10  ;;  %v2025_v60 = vsub.f32 %v4772_v43, %v2007_v28  ;;  %v4775_v43 = vld [vmem:[#allocation26_spill] sm:$0xff] }
 0x202   : > { %v824_v35 = vmul.f32 %v823_v52, %v4766_v3  ;;  %vm825_vm4 = vcmp.eq.f32.partialorder %v4766_v3, inf  ;;  %vm827_vm5 = vcmp.eq.f32.partialorder %v4766_v3, 0.0  ;;  %v1370_v9 = vmul.f32 %v4321_v0, %v1369_v21  ;;  %1988 = vmax.xlane.f32.xlu2 %v4445_v33 }
 0x203   : > { %v1935_v36 = vmul.f32 %v1919_v53, %v1903_v63  ;;  %v874_v34 = vsel %vm873_vm13, %v4738_v30, %v872_v19  ;;  %v1418_v31 = vmul.f32 %v2511_v26, %v1417_v24  ;;  %v828_v22 = vand.u32 2147483648, %v4766_v3 }
 0x204   : > { %v826_v38 = vsel %vm825_vm4, %v4766_v3, %v824_v35  ;;  %v1371_v16 = vmul.f32 %v1370_v9, %v4171_v20  ;;  %vm1372_vm6 = vcmp.eq.f32.partialorder %v4171_v20, inf  ;;  %v1375_v51 = vand.u32 2147483648, %v4171_v20 }
 0x205   : > { %v1419_v0 = vmul.f32 %v1418_v31, %v4266_v5  ;;  %v829_v12 = vsel %vm827_vm5, %v828_v22, %v826_v38  ;;  %v1951_v53 = vadd.f32 %v1935_v36, %v1548_v18  ;;  %v2054_v42 = vmul.f32 1.442695, %v2025_v60 }
 0x206   : > { %v877_v26 = vsel %vm875_vm0, %v876_v59, %v874_v34  ;;  %v1423_v15 = vand.u32 2147483648, %v4266_v5  ;;  %v1373_v3 = vsel %vm1372_vm6, %v4171_v20, %v1371_v16  ;;  %vm1374_vm7 = vcmp.eq.f32.partialorder %v4171_v20, 0.0 }
 0x207   : > { %v2513_v6 = vpop.eup %2512  ;;  %v1421_v50 = vsel %vm1420_vm2, %v4266_v5, %v1419_v0  ;;  %v1376_v14 = vsel %vm1374_vm7, %v1375_v51, %v1373_v3  ;;  %v4474_v45 = vmul.f32 100.0, %v1951_v53  ;;  %v4476_v27 = vmul.f32 100.0, %v1950_v55 }
 0x208   : > { %v1424_v30 = vsel %vm1422_vm3, %v1423_v15, %v1421_v50  ;;  %v999_v18 = vsub.f32 0.0, %v829_v12  ;;  %v1546_v59 = vsub.f32 0.0, %v1376_v14  ;;  %v1691_v49 = vmul.f32 %v2513_v6, %v4440_v10 }
 0x209   : > { %v1003_v29 = vsub.f32 0.0, %v877_v26  ;;  %v1550_v37 = vsub.f32 0.0, %v1424_v30  ;;  %1986 = vmax.xlane.f32.xlu0 %v4474_v45  ;;  %2514 = vpow2.f32 %v2054_v42  ;;  %v1905_v40 = vmul.f32 %v4394_v2, %v3982_v46 }
 0x20a   : > { %v1692_v20 = vsub.f32 1.0, %v1691_v49  ;;  %v1917_v25 = vsub.f32 %v999_v18, %v1546_v59  ;;  %1984 = vmax.xlane.f32.xlu2 %v4476_v27  ;;  %v1679_v5 = vmul.f32 %v4258_v11, %v1678_v17  ;;  %vm1682_vm8 = vweird.f32 %v4258_v11  ;;  %v2011_v17 = vpop.xlane.xlu1 %2010 }
 0x20b   : > { %v1921_v55 = vsub.f32 %v1003_v29, %v1550_v37  ;;  %vm1696_vm9 = vweird.f32 %v2513_v6  ;;  %vm1681_vm10 = vweird.f32 %v4196_v48  ;;  %v1685_v46 = vand.u32 2147483647, %v4196_v48 }
 0x20c   : > { %v1693_v28 = vmul.f32 %v2513_v6, %v1692_v20  ;;  %v1680_v62 = vadd.f32 %v4258_v11, %v1679_v5  ;;  %v1687_v58 = vand.u32 2147483648, %v4196_v48  ;;  %v1701_v2 = vand.u32 2147483648, %v4440_v10  ;;  %vm4496_vm11 = vmor %vm1681_vm10, %vm1682_vm8 }
 0x20d   : > { %v1937_v8 = vmul.f32 %v1921_v55, %v1905_v40  ;;  %vm1695_vm12 = vweird.f32 %v4440_v10  ;;  %v1699_v24 = vand.u32 2147483647, %v4440_v10  ;;  %v2027_v60 = vsub.f32 %v4775_v43, %v2011_v17 }
 0x20e   : > { %v1694_v52 = vadd.f32 %v2513_v6, %v1693_v28  ;;  %vm1697_vm13 = vmor %vm1695_vm12, %vm1696_vm9  ;;  %v1684_v48 = vsel %vm4496_vm11, %v4258_v11, %v1680_v62  ;;  %v1688_v36 = vor.u32 1.1754944e-38, %v1687_v58  ;;  %v1702_v34 = vor.u32 1.1754944e-38, %v1701_v2 }
 0x20f   : > { %v4489_v19 = vpop.eup %2514  ;;  %v1953_v54 = vadd.f32 %v1937_v8, %v1550_v37  ;;  %v2058_v9 = vmul.f32 1.442695, %v2027_v60  ;;  %vm1686_vm14 = vcmp.eq.f32.partialorder %v1685_v46, 8.507059e+37  ;;  %vm1700_vm15 = vcmp.eq.f32.partialorder %v1699_v24, 8.507059e+37 }
 0x210   : > { %v1698_v35 = vsel %vm1697_vm13, %v2513_v6, %v1694_v52  ;;  %v1689_v31 = vsel %vm1686_vm14, %v1688_v36, %v1684_v48 }
 0x211   : > { %v4500_v63 = vmul.f32 100.0, %v1953_v54  ;;  %2516 = vpow2.f32 %v2058_v9  ;;  %v1703_v10 = vsel %vm1700_vm15, %v1702_v34, %v1698_v35  ;;  %v1900_v22 = vmul.f32 %v1689_v31, %v4162_v7 }
 0x212   : > { %2086 = vadd.xlane.f32.xlu2 %v4489_v19  ;;  %v1901_v38 = vmul.f32 %v1703_v10, %v4412_v32 }
 0x213   : > { %1990 = vmax.xlane.f32.xlu1 %v4500_v63  ;;  %v1932_v11 = vmul.f32 %v4252_v44, %v1900_v22 }
 0x214   : > { %v1933_v51 = vmul.f32 %v1917_v25, %v1901_v38 }
 0x215   : > { %v1948_v0 = vadd.f32 %v1932_v11, %v1545_v41 }
 0x216   : > { %v1949_v12 = vadd.f32 %v1933_v51, %v1546_v59 }
 0x217   : > { %v4512_v16 = vpop.eup %2516  ;;  %v4529_v50 = vmul.f32 100.0, %v1948_v0 }
 0x218   : > { %v4518_v53 = vmul.f32 100.0, %v1949_v12 }
 0x21b   : > { %2090 = vadd.xlane.f32.xlu1 %v4512_v16 }
 0x223   : > { %1982 = vmax.xlane.f32.xlu1 %v4518_v53  ;;  %v2009_v42 = vpop.xlane.xlu2 %2008 }
 0x224   : > { %v2026_v7 = vsub.f32 %v3977_v57, %v2009_v42 }
 0x226   : > { %v2056_v26 = vmul.f32 1.442695, %v2026_v7 }
 0x228   : > { %2518 = vpow2.f32 %v2056_v26 }
 0x22c   : > { %v2003_v32 = vpop.xlane.xlu1 %2002 }
 0x22d   : > { %v2023_v15 = vsub.f32 %v4014_v39, %v2003_v32 }
 0x22e   : > { %v4523_v6 = vpop.eup %2518 }
 0x22f   : > { %v2050_v3 = vmul.f32 1.442695, %v2023_v15  ;;  %2088 = vadd.xlane.f32.xlu0 %v4523_v6 }
 0x230   : > { %v1999_v39 = vpop.xlane.xlu0 %1998 }
 0x231   : > { %2520 = vpow2.f32 %v2050_v3  ;;  %v2021_v59 = vsub.f32 %v4044_v47, %v1999_v39 }
 0x235   : > { %v1997_v56 = vpop.xlane.xlu1 %1996 }
 0x236   : > { %v2020_v41 = vsub.f32 %v4078_v23, %v1997_v56  ;;  %v2046_v23 = vmul.f32 1.442695, %v2021_v59 }
 0x237   : > { %v4527_v44 = vpop.eup %2520  ;;  %1980 = vmax.xlane.f32.xlu0 %v4529_v50 }
 0x238   : > { %v2044_v14 = vmul.f32 1.442695, %v2020_v41  ;;  %2082 = vadd.xlane.f32.xlu2 %v4527_v44 }
 0x23a   : > { %v2005_v57 = vpop.xlane.xlu2 %2004  ;;  %2522 = vpow2.f32 %v2044_v14 }
 0x23b   : > { %v2024_v30 = vsub.f32 %v4103_v61, %v2005_v57 }
 0x23d   : > { %v2052_v18 = vmul.f32 1.442695, %v2024_v30 }
 0x23f   : > { %2524 = vpow2.f32 %v2052_v18 }
 0x240   : > { %v4535_v49 = vpop.eup %2522  ;;  %2526 = vpow2.f32 %v2046_v23 }
 0x241   : > { %2076 = vadd.xlane.f32.xlu2 %v4535_v49 }
 0x242   : > { %v2001_v29 = vpop.xlane.xlu2 %2000 }
 0x243   : > { %v2022_v37 = vsub.f32 %v4142_v13, %v2001_v29 }
 0x245   : > { %v4539_v20 = vpop.eup %2524  ;;  %v2048_v25 = vmul.f32 1.442695, %v2022_v37 }
 0x246   : > { %2084 = vadd.xlane.f32.xlu1 %v4539_v20  ;;  %v4542_v61 = vpop.eup %2526 }
 0x247   : > { %2528 = vpow2.f32 %v2048_v25 }
 0x24d   : > { %v4544_v40 = vpop.eup %2528 }
 0x24e   : > { %2078 = vadd.xlane.f32.xlu1 %v4542_v61  ;;  %2080 = vadd.xlane.f32.xlu0 %v4544_v40 }
 0x258   : > { %v1995_v47 = vpop.xlane.xlu2 %1994 }
 0x259   : > { %v2019_v5 = vsub.f32 %v4271_v1, %v1995_v47 }
 0x25b   : > { %v2042_v55 = vmul.f32 1.442695, %v2019_v5 }
 0x25d   : > { %2530 = vpow2.f32 %v2042_v55 }
 0x263   : > { %v4549_v13 = vpop.eup %2530 }
 0x264   : > { %2074 = vadd.xlane.f32.xlu0 %v4549_v13 }
 0x26f   : > { %v1993_v28 = vpop.xlane.xlu0 %1992 }
 0x270   : > { %v2018_v8 = vsub.f32 %v4417_v4, %v1993_v28 }
 0x272   : > { %v2040_v62 = vmul.f32 1.442695, %v2018_v8 }
 0x274   : > { %2532 = vpow2.f32 %v2040_v62 }
 0x275   : > { %v1989_v54 = vpop.xlane.xlu2 %1988 }
 0x276   : > { %v2016_v52 = vsub.f32 %v4445_v33, %v1989_v54 }
 0x278   : > { %v2036_v46 = vmul.f32 1.442695, %v2016_v52 }
 0x27a   : > { %2534 = vpow2.f32 %v2036_v46  ;;  %v4554_v58 = vpop.eup %2532 }
 0x27b   : > { %2072 = vadd.xlane.f32.xlu1 %v4554_v58 }
 0x27c   : > { %v1987_v1 = vpop.xlane.xlu0 %1986 }
 0x27d   : > { %v2015_v2 = vsub.f32 %v4474_v45, %v1987_v1  ;;  %v1985_v24 = vpop.xlane.xlu2 %1984 }
 0x27e   : > { %v2014_v48 = vsub.f32 %v4476_v27, %v1985_v24  ;;  %v2581_v24 = vld [vmem:[%s2950_s16] sm:$0x7]  ;;  %s2598_s16 = scalar_lea.hbm %s2597_s17, 4 }
 0x27f   : > { %v2034_v17 = vmul.f32 1.442695, %v2015_v2  ;;  %p2599_p12 = scmp.ne.s32.totalorder %s2597_s17, %s2598_s16  ;;  %p2604_p2 = scmp.lt.s32.totalorder %s2602_s19, %s2598_s16 }
 0x280   : > { %v4558_v21 = vpop.eup %2534  ;;  %v2032_v35 = vmul.f32 1.442695, %v2014_v48 }
 0x281   : > { %2536 = vpow2.f32 %v2034_v17  ;;  %2068 = vadd.xlane.f32.xlu0 %v4558_v21  ;;  %p2600_p13 = pnand %p2599_p12, %p2740_p4  ;;  %p2605_p3 = por %p2604_p2, %p2603_p1 }
 0x283   : > { %p2601_p0 = pneg %p2600_p13 }
 0x285   : > { %v2087_v38 = vpop.xlane.xlu2 %2086  ;;  %p2606_p5 = pnand %p2605_p3, %p2601_p0 }
 0x286   : > { %v1991_v4 = vpop.xlane.xlu1 %1990 }
 0x287   : > { %v4561_v43 = vpop.eup %2536  ;;  %v2017_v33 = vsub.f32 %v4500_v63, %v1991_v4 }
 0x288   : > { %2066 = vadd.xlane.f32.xlu1 %v4561_v43 }
 0x289   : > { %v2038_v60 = vmul.f32 1.442695, %v2017_v33 }
 0x28b   : > { %2538 = vpow2.f32 %v2038_v60 }
 0x28e   : > { %v2091_v45 = vpop.xlane.xlu1 %2090 }
 0x28f   : > { %2540 = vrcp.f32 %v2091_v45 }
 0x290   : > { %2542 = vpow2.f32 %v2032_v35 }
 0x291   : > { %v4566_v9 = vpop.eup %2538 }
 0x292   : > { %2070 = vadd.xlane.f32.xlu2 %v4566_v9 }
 0x295   : > { %v2541_v36 = vpop.eup %2540 }
 0x296   : > { %v4569_v34 = vpop.eup %2542  ;;  %v2123_v31 = vmul.f32 %v2541_v36, %v4512_v16  ;;  %v1983_v63 = vpop.xlane.xlu1 %1982 }
 0x297   : > { %v2013_v10 = vsub.f32 %v4518_v53, %v1983_v63 }
 0x298   : > { %2124 = vmatpush.xpose.msra.mxu0 %v2123_v31 }
 0x299   : > { %v2030_v27 = vmul.f32 1.442695, %v2013_v10 }
 0x29a   : > { %2064 = vadd.xlane.f32.xlu2 %v4569_v34 }
 0x29b   : > { %2544 = vpow2.f32 %v2030_v27 }
 0x2a1   : > { %v4574_v22 = vpop.eup %2544 }
 0x2a2   : > { %2062 = vadd.xlane.f32.xlu0 %v4574_v22  ;;  %v2089_v11 = vpop.xlane.xlu0 %2088 }
 0x2a3   : > { %2546 = vrcp.f32 %v2089_v11 }
 0x2a4   : > { %2548 = vrcp.f32 %v2087_v38 }
 0x2a9   : > { %v2547_v51 = vpop.eup %2546 }
 0x2aa   : > { %v1981_v0 = vpop.xlane.xlu0 %1980  ;;  %v2122_v16 = vmul.f32 %v2547_v51, %v4523_v6  ;;  %v2549_v12 = vpop.eup %2548 }
 0x2ab   : > { %v2012_v53 = vsub.f32 %v4529_v50, %v1981_v0  ;;  %v2121_v7 = vmul.f32 %v2549_v12, %v4489_v19  ;;  %v2083_v26 = vpop.xlane.xlu2 %2082 }
 0x2ac   : > { %2125 = vmatpush.xpose.msra.mxu0 %v2122_v16 }
 0x2ad   : > { %v2028_v42 = vmul.f32 1.442695, %v2012_v53 }
 0x2af   : > { %2550 = vpow2.f32 %v2028_v42 }
 0x2b0   : > { %2126 = vmatpush.xpose.msra.mxu0 %v2121_v7  ;;  %2552 = vrcp.f32 %v2083_v26 }
 0x2b4   : > { %v2077_v14 = vpop.xlane.xlu2 %2076 }
 0x2b5   : > { %v4580_v32 = vpop.eup %2550 }
 0x2b6   : > { %2060 = vadd.xlane.f32.xlu1 %v4580_v32  ;;  %v2553_v3 = vpop.eup %2552 }
 0x2b7   : > { %v2119_v19 = vmul.f32 %v2553_v3, %v4527_v44 }
 0x2b9   : > { %v2085_v15 = vpop.xlane.xlu1 %2084 }
 0x2ba   : > { %2554 = vrcp.f32 %v2085_v15 }
 0x2c0   : > { %v2555_v56 = vpop.eup %2554 }
 0x2c1   : > { %v2120_v6 = vmul.f32 %v2555_v56, %v4539_v20  ;;  %v2081_v41 = vpop.xlane.xlu0 %2080  ;;  %v2079_v50 = vpop.xlane.xlu1 %2078 }
 0x2c2   : > { %2556 = vrcp.f32 %v2081_v41 }
 0x2c3   : > { %2127 = vmatpush.xpose.msra.mxu0 %v2120_v6  ;;  %2558 = vrcp.f32 %v2079_v50 }
 0x2c4   : > { %2560 = vrcp.f32 %v2077_v14 }
 0x2c7   : > { %2128 = vmatpush.xpose.msra.mxu0 %v2119_v19 }
 0x2c8   : > { %v2557_v57 = vpop.eup %2556 }
 0x2c9   : > { %v2118_v39 = vmul.f32 %v2557_v57, %v4544_v40  ;;  %v2559_v30 = vpop.eup %2558 }
 0x2ca   : > { %v2117_v18 = vmul.f32 %v2559_v30, %v4542_v61  ;;  %v2561_v59 = vpop.eup %2560 }
 0x2cb   : > { %2129 = vmatpush.xpose.msra.mxu0 %v2118_v39  ;;  %v2116_v23 = vmul.f32 %v2561_v59, %v4535_v49 }
 0x2cf   : > { %2130 = vmatpush.xpose.msra.mxu0 %v2117_v18 }
 0x2d3   : > { %2131 = vmatpush.xpose.msra.mxu0 %v2116_v23 }
 0x2d7   : > { %v2075_v29 = vpop.xlane.xlu0 %2074 }
 0x2d8   : > { %2562 = vrcp.f32 %v2075_v29 }
 0x2de   : > { %v2563_v37 = vpop.eup %2562 }
 0x2df   : > { %v2115_v44 = vmul.f32 %v2563_v37, %v4549_v13 }
 0x2e1   : > { %2132 = vmatpush.xpose.msra.mxu0 %v2115_v44 }
 0x2ee   : > { %v2073_v20 = vpop.xlane.xlu1 %2072 }
 0x2ef   : > { %2564 = vrcp.f32 %v2073_v20 }
 0x2f4   : > { %v2069_v47 = vpop.xlane.xlu0 %2068 }
 0x2f5   : > { %v2565_v25 = vpop.eup %2564  ;;  %2566 = vrcp.f32 %v2069_v47 }
 0x2f6   : > { %v2114_v40 = vmul.f32 %v2565_v25, %v4554_v58 }
 0x2f8   : > { %2133 = vmatpush.xpose.msra.mxu0 %v2114_v40 }
 0x2fb   : > { %v2067_v61 = vpop.xlane.xlu1 %2066  ;;  %v2567_v49 = vpop.eup %2566 }
 0x2fc   : > { %v2112_v13 = vmul.f32 %v2567_v49, %v4558_v21 }
 0x305   : > { %v2071_v5 = vpop.xlane.xlu2 %2070 }
 0x306   : > { %2568 = vrcp.f32 %v2071_v5 }
 0x307   : > { %2570 = vrcp.f32 %v2067_v61 }
 0x30c   : > { %v2569_v55 = vpop.eup %2568 }
 0x30d   : > { %v2113_v28 = vmul.f32 %v2569_v55, %v4566_v9  ;;  %v2065_v8 = vpop.xlane.xlu2 %2064  ;;  %v2571_v62 = vpop.eup %2570 }
 0x30e   : > { %2572 = vrcp.f32 %v2065_v8  ;;  %v2111_v54 = vmul.f32 %v2571_v62, %v4561_v43 }
 0x30f   : > { %2134 = vmatpush.xpose.msra.mxu0 %v2113_v28 }
 0x313   : > { %2135 = vmatpush.xpose.msra.mxu0 %v2112_v13 }
 0x314   : > { %v2573_v52 = vpop.eup %2572 }
 0x315   : > { %v2063_v46 = vpop.xlane.xlu0 %2062  ;;  %v2110_v58 = vmul.f32 %v2573_v52, %v4569_v34 }
 0x316   : > { %2574 = vrcp.f32 %v2063_v46 }
 0x317   : > { %2136 = vmatpush.xpose.msra.mxu0 %v2111_v54 }
 0x31b   : > { %2137 = vmatpush.xpose.msra.mxu0 %v2110_v58 }
 0x31c   : > { %v2575_v1 = vpop.eup %2574 }
 0x31d   : > { %v2109_v2 = vmul.f32 %v2575_v1, %v4574_v22 }
 0x31f   : > { %2138 = vmatpush.xpose.msra.mxu0 %v2109_v2 }
 0x329   : > { %v2061_v17 = vpop.xlane.xlu1 %2060 }
 0x32a   : > { %2576 = vrcp.f32 %v2061_v17 }
 0x330   : > { %v2577_v21 = vpop.eup %2576 }
 0x331   : > { %v2108_v4 = vmul.f32 %v2577_v21, %v4580_v32 }
 0x333   : > { %2139 = vmatpush.xpose.msra.mxu0 %v2108_v4 }
 0x336   : > { %2140 = vmatmul.f32.vlgmr.msra.gmra.mxu0 %v2581_v24 }
 0x3b3   : > { %v2141_v43 = vpop.f32.mrf.mxu0 }
 0x3b4   : > { %2144 = vst [vmem:[%s358_s8] sm:$0x7] %v2141_v43 }
 0x3b5   : > { %2609 = shalt.err (!%p2606_p5)
}
 0x3b6   : > { %2326 = dma.vmem_to_hbm [thread:$0]  (%p2740_p4), %s2160_s12, 64, %s2162_s13, %s2146_s14  }
 0x3b7 PF: > { %p2332_p6 = scmp.ge.s32.totalorder %s2660_s26, 2  ;;  %s2173_s11 = sand.u32 1, %s2640_s21  }
 0x3b8   : > { %s2174_s27 = scalar_lea.sflag [#allocation3], %s2173_s11 }
 0x3b9   : > { %p2329_p7 = pnand %p2332_p6, %p2747_p8 }
 0x3bb   : > { %p2330_p9 = pneg %p2329_p7 }
 0x3bd   : > { %2635 = dma.done.wait (%p2330_p9), %s2174_s27, 64  }
 0x3be   : > { %2637 = vsyncadd (%p2330_p9), %s2174_s27, 4294967232  ;;  %s19_s26 = sadd.s32 1, %s2660_s26   ;;  %s4776_s21 = smov %s2644_s22 }
 0x3bf   : > { %p16_p10 = scmp.ge.s32.totalorder %s19_s26, 5   ;;  %s4777_s22 = smov %s2648_s23 }
 0x3c0   : > { %s4778_s23 = smov %s2753_s10  ;;  %s4779_s24 = smov %s2656_s25 }
 0x3c1   : > { %s4780_s25 = smov %s4782_s29  ;;  %18 = sbr.rel (!%p16_p10) target bundleno = 4 (0x4), region = 94 }
 0x3c6   :  { %2180 = vsyncpa [#allocation3], 1 }
 0x3c7   :  { %2182 = vsyncpa [#allocation3 + $0x1], 1 }

</bundles_post_ra>
